<compile_context>
chip_gen: v7x
topology: tpu7x:2x2x1
jax: 0.10.0
libtpu: 0.0.40
codegen_flags: <defaults>
</compile_context>

<pallas_src>
import functools

import jax
import jax.numpy as jnp
from jax.experimental import pallas as pl
from jax.experimental.pallas import tpu as pltpu

LAYER_SIZE = 64
BN_EPS = 1e-5


# ---------------------------------------------------------------------------
# Fused Pallas kernel: whole forward pass in one launch
# ---------------------------------------------------------------------------
def gcn_fused_kernel(
    feat_cnn_ref, adjbd_cnn_ref,        # [B*Nc, Fc], [B*Nc, B*Nc] (block-diag)
    feat_rhn_ref, adjbd_rhn_ref,        # [B*Nr, Fr], [B*Nr, B*Nr] (block-diag)
    w1_cnn_ref, w1_rhn_ref,             # [Fc, C], [Fr, C]
    wl_ref,                             # [6, C, C]  (cnn L2-4, rhn L2-4)
    gb_ref,                             # [8, 2, C]  (cnn L1-4, rhn L1-4)
    fc_ref,                             # [2, 2C]    (row0 = W, row1[0] = b)
    emb_ref, y_ref,                     # outputs: [B, 2C], [B, 1]
    *, ifsigmoid, batch):

    mxu = jnp.bfloat16

    def bn_relu(h, gamma, beta):
        # One-pass training-mode BatchNorm1d over the (B*N) rows per channel,
        # biased variance, folded into a single scale/shift, fused with ReLU.
        inv_cnt = 1.0 / float(h.shape[0])
        c = h.shape[1]
        hs = jnp.concatenate([h, h * h], axis=-1)        # [B*N, 2C] = 128 lanes
        sums = jnp.sum(hs, axis=0, keepdims=True)        # ONE XLU reduction
        mean = sums[:, :c] * inv_cnt
        var = jnp.maximum(sums[:, c:] * inv_cnt - mean * mean, 0.0)
        scale = gamma * jax.lax.rsqrt(var + BN_EPS)
        shift = beta - mean * scale
        return jnp.maximum(h * scale + shift, 0.0)

    def gc_rest(h, adj_bf, w):
        # support = h @ W, then block-diag adj @ support (single 2D MXU ops).
        support = jnp.dot(h.astype(mxu), w.astype(mxu),
                          preferred_element_type=jnp.float32)
        return jnp.dot(adj_bf, support.astype(mxu),
                       preferred_element_type=jnp.float32)

    def gc_first(x_bf, adj_bf, w1):
        # Associativity: adj @ x first (contraction width Fin < C), then @ W1.
        agg = jnp.dot(adj_bf, x_bf, preferred_element_type=jnp.float32)
        return jnp.dot(agg.astype(mxu), w1.astype(mxu),
                       preferred_element_type=jnp.float32)

    def branch(feat_ref, adjbd_ref, w1_ref, bi):
        n = feat_ref.shape[0] // batch
        adj_bf = adjbd_ref[...].astype(mxu)      # loaded & cast once, reused 4x
        x_bf = feat_ref[...].astype(mxu)

        gb = gb_ref[bi * 4]                      # [2, C]
        h = bn_relu(gc_first(x_bf, adj_bf, w1_ref[...]), gb[0:1, :], gb[1:2, :])
        for l in range(3):                       # layers 2..4, unrolled
            gb = gb_ref[bi * 4 + 1 + l]
            h = bn_relu(gc_rest(h, adj_bf, wl_ref[bi * 3 + l]),
                        gb[0:1, :], gb[1:2, :])

        # Last node of each graph: rows n-1, 2n-1, ... (static, unrolled).
        return jnp.concatenate(
            [h[(b + 1) * n - 1:(b + 1) * n, :] for b in range(batch)], axis=0)

    emb_cnn = branch(feat_cnn_ref, adjbd_cnn_ref, w1_cnn_ref, 0)   # [B, C]
    emb_rhn = branch(feat_rhn_ref, adjbd_rhn_ref, w1_rhn_ref, 1)   # [B, C]

    emb = jnp.concatenate([emb_cnn, emb_rhn], axis=1)               # [B, 2C]
    emb_ref[...] = emb

    # FC(2C -> 1) on the VPU: broadcast-mul + lane reduce (no 1-column MXU op).
    fc_w = fc_ref[0:1, :]                        # [1, 2C]
    fc_b = fc_ref[1:2, 0:1]                      # [1, 1]
    y = jnp.sum(emb * fc_w, axis=-1, keepdims=True) + fc_b
    if ifsigmoid:
        y = jax.nn.sigmoid(y)
    y_ref[...] = y


# ---------------------------------------------------------------------------
# Wrapper
# ---------------------------------------------------------------------------
def _block_diag(adj):
    # [B, N, N] -> block-diagonal [B*N, B*N] so the whole batch is one matmul.
    b, n, _ = adj.shape
    eye = jnp.eye(b, dtype=adj.dtype)
    return jnp.einsum("bc,bnm->bncm", eye, adj).reshape(b * n, b * n)


def gcn_forward(params, feat_cnn, adj_cnn, feat_rhn, adj_rhn,
                ifsigmoid=True, extract_embedding=False):
    B, n_cnn, f_cnn = feat_cnn.shape
    _, n_rhn, f_rhn = feat_rhn.shape
    size = params["wl_all"].shape[-1]

    # TODO(synk): block-diag adjacency grows as (B*N)^2; for large B switch to
    # a B-tiled grid ("parallel") with batched matmuls and per-tile BN masking.
    feat_cnn2 = feat_cnn.reshape(B * n_cnn, f_cnn)
    feat_rhn2 = feat_rhn.reshape(B * n_rhn, f_rhn)
    adj_cnn_bd = _block_diag(adj_cnn)
    adj_rhn_bd = _block_diag(adj_rhn)

    vmem = pl.BlockSpec(memory_space=pltpu.MemorySpace.VMEM)
    emb, y = pl.pallas_call(
        functools.partial(gcn_fused_kernel, ifsigmoid=ifsigmoid, batch=B),
        out_shape=(jax.ShapeDtypeStruct((B, 2 * size), jnp.float32),
                   jax.ShapeDtypeStruct((B, 1), jnp.float32)),
        in_specs=[vmem] * 9,
        out_specs=(vmem, vmem),
    )(feat_cnn2, adj_cnn_bd, feat_rhn2, adj_rhn_bd,
      params["w1_cnn"], params["w1_rhn"],
      params["wl_all"], params["gb_all"], params["fc"])

    if extract_embedding:
        return emb
    return y


# ---------------------------------------------------------------------------
# Deterministic parameter construction (mirrors GCN.__init__ / init_weights),
# packed for minimal DMA count.
# ---------------------------------------------------------------------------
def make_params(key, nfeat_cnn, nfeat_rhn, size=LAYER_SIZE):
    keys = jax.random.split(key, 10)

    def w(k, fin, fout):
        return jax.random.uniform(k, (fin, fout), jnp.float32, -0.05, 0.05)

    # NOTE: GraphConvolution bias omitted on purpose -- exactly cancelled by
    # the training-mode BatchNorm mean subtraction following every GC layer.
    wl_all = jnp.stack([w(keys[1], size, size),   # cnn layers 2-4
                        w(keys[2], size, size),
                        w(keys[3], size, size),
                        w(keys[5], size, size),   # rhn layers 2-4
                        w(keys[6], size, size),
                        w(keys[7], size, size)])                      # [6, C, C]
    gb_all = jnp.stack([jnp.ones((8, size), jnp.float32),             # gamma
                        jnp.zeros((8, size), jnp.float32)], axis=1)   # beta -> [8,2,C]

    bound = 1.0 / (2.0 * size) ** 0.5
    fc_w = jax.random.uniform(keys[8], (1, 2 * size), jnp.float32, -bound, bound)
    fc_b = jax.random.uniform(keys[9], (1, 1), jnp.float32, -bound, bound)
    fc = jnp.concatenate(
        [fc_w,
         jnp.zeros((1, 2 * size), jnp.float32).at[0, 0].set(fc_b[0, 0])],
        axis=0)                                                       # [2, 2C]

    return {
        "w1_cnn": w(keys[0], nfeat_cnn, size),
        "w1_rhn": w(keys[4], nfeat_rhn, size),
        "wl_all": wl_all,
        "gb_all": gb_all,
        "fc": fc,
    }


# ---------------------------------------------------------------------------
if __name__ == "__main__":
    key = jax.random.PRNGKey(0)
    k_feat_c, k_adj_c, k_feat_r, k_adj_r, k_params = jax.random.split(key, 5)

    B = 2
    N_CNN, NFEAT_CNN = 16, 16
    N_RHN, NFEAT_RHN = 8, 8

    feat_cnn = jax.random.normal(k_feat_c, (B, N_CNN, NFEAT_CNN), jnp.float32)
    adj_cnn = jax.random.uniform(k_adj_c, (B, N_CNN, N_CNN), jnp.float32)
    feat_rhn = jax.random.normal(k_feat_r, (B, N_RHN, NFEAT_RHN), jnp.float32)
    adj_rhn = jax.random.uniform(k_adj_r, (B, N_RHN, N_RHN), jnp.float32)

    params = make_params(k_params, NFEAT_CNN, NFEAT_RHN, LAYER_SIZE)

    fwd = jax.jit(functools.partial(gcn_forward, ifsigmoid=True,
                                    extract_embedding=False))
    out = fwd(params, feat_cnn, adj_cnn, feat_rhn, adj_rhn)
    out = jax.block_until_ready(out)
    assert out.shape == (B, 1), out.shape
    assert bool(jnp.all(jnp.isfinite(out)))

    # Embedding-extraction path also exercises the fused kernel.
    emb = jax.block_until_ready(
        gcn_forward(params, feat_cnn, adj_cnn, feat_rhn, adj_rhn,
                    ifsigmoid=True, extract_embedding=True))
    assert emb.shape == (B, 2 * LAYER_SIZE), emb.shape
    assert bool(jnp.all(jnp.isfinite(emb)))

    print("KERNEL_OK")
</pallas_src>

<mosaic_0001>
module attributes {stable_mosaic.version = 11 : i64} {
  func.func @gcn_fused_kernel(%arg0: memref<32x16xf32, #tpu.memory_space<vmem>>, %arg1: memref<32x32xf32, #tpu.memory_space<vmem>>, %arg2: memref<16x8xf32, #tpu.memory_space<vmem>>, %arg3: memref<16x16xf32, #tpu.memory_space<vmem>>, %arg4: memref<16x64xf32, #tpu.memory_space<vmem>>, %arg5: memref<8x64xf32, #tpu.memory_space<vmem>>, %arg6: memref<6x64x64xf32, #tpu.memory_space<vmem>>, %arg7: memref<8x2x64xf32, #tpu.memory_space<vmem>>, %arg8: memref<2x128xf32, #tpu.memory_space<vmem>>, %arg9: memref<2x128xf32, #tpu.memory_space<vmem>>, %arg10: memref<2x1xf32, #tpu.memory_space<vmem>>) attributes {dimension_semantics = [], scalar_prefetch = 0 : i64, scratch_operands = 0 : i64, tpu.core_type = #tpu.core_type<tc>} {
    %c0 = arith.constant 0 : index
    %c0_0 = arith.constant 0 : index
    %0 = vector.load %arg1[%c0, %c0_0] : memref<32x32xf32, #tpu.memory_space<vmem>>, vector<32x32xf32>
    %1 = arith.truncf %0 : vector<32x32xf32> to vector<32x32xbf16>
    %c0_1 = arith.constant 0 : index
    %c0_2 = arith.constant 0 : index
    %2 = vector.load %arg0[%c0_1, %c0_2] : memref<32x16xf32, #tpu.memory_space<vmem>>, vector<32x16xf32>
    %3 = arith.truncf %2 : vector<32x16xf32> to vector<32x16xbf16>
    %c0_3 = arith.constant 0 : index
    %c0_4 = arith.constant 0 : index
    %c0_5 = arith.constant 0 : index
    %4 = vector.load %arg7[%c0_3, %c0_4, %c0_5] : memref<8x2x64xf32, #tpu.memory_space<vmem>>, vector<1x2x64xf32>
    %5 = vector.shape_cast %4 : vector<1x2x64xf32> to vector<2x64xf32>
    %c0_6 = arith.constant 0 : index
    %c0_7 = arith.constant 0 : index
    %6 = vector.load %arg4[%c0_6, %c0_7] : memref<16x64xf32, #tpu.memory_space<vmem>>, vector<16x64xf32>
    %cst = arith.constant dense<0.000000e+00> : vector<32x16xf32>
    %7 = tpu.matmul %1, %3, %cst {dimension_numbers = #tpu.dot_dimension_numbers<[1], [0], [0], [1], [0, 0, 1, 1], [], []>} : vector<32x32xbf16>, vector<32x16xbf16>, vector<32x16xf32> -> vector<32x16xf32>
    %8 = arith.truncf %7 : vector<32x16xf32> to vector<32x16xbf16>
    %9 = arith.truncf %6 : vector<16x64xf32> to vector<16x64xbf16>
    %cst_8 = arith.constant dense<0.000000e+00> : vector<32x64xf32>
    %10 = tpu.matmul %8, %9, %cst_8 {dimension_numbers = #tpu.dot_dimension_numbers<[1], [0], [0], [1], [0, 0, 1, 1], [], []>} : vector<32x16xbf16>, vector<16x64xbf16>, vector<32x64xf32> -> vector<32x64xf32>
    %11 = vector.extract_strided_slice %5 {offsets = [0, 0], sizes = [1, 64], strides = [1, 1]} : vector<2x64xf32> to vector<1x64xf32>
    %12 = vector.extract_strided_slice %5 {offsets = [1, 0], sizes = [1, 64], strides = [1, 1]} : vector<2x64xf32> to vector<1x64xf32>
    %13 = arith.mulf %10, %10 : vector<32x64xf32>
    %14 = tpu.concatenate %10, %13 in 1 : vector<32x64xf32>, vector<32x64xf32> -> vector<32x128xf32>
    %cst_9 = arith.constant dense<0.000000e+00> : vector<128xf32>
    %15 = vector.multi_reduction <add>, %14, %cst_9 [0] : vector<32x128xf32> to vector<128xf32>
    %16 = vector.shape_cast %15 : vector<128xf32> to vector<1x128xf32>
    %17 = vector.extract_strided_slice %16 {offsets = [0, 0], sizes = [1, 64], strides = [1, 1]} : vector<1x128xf32> to vector<1x64xf32>
    %cst_10 = arith.constant 3.125000e-02 : f32
    %18 = vector.broadcast %cst_10 : f32 to vector<1x64xf32>
    %19 = arith.mulf %17, %18 : vector<1x64xf32>
    %20 = vector.extract_strided_slice %16 {offsets = [0, 64], sizes = [1, 64], strides = [1, 1]} : vector<1x128xf32> to vector<1x64xf32>
    %cst_11 = arith.constant 3.125000e-02 : f32
    %21 = vector.broadcast %cst_11 : f32 to vector<1x64xf32>
    %22 = arith.mulf %20, %21 : vector<1x64xf32>
    %23 = arith.mulf %19, %19 : vector<1x64xf32>
    %24 = arith.subf %22, %23 : vector<1x64xf32>
    %cst_12 = arith.constant 0.000000e+00 : f32
    %25 = vector.broadcast %cst_12 : f32 to vector<1x64xf32>
    %26 = arith.maximumf %24, %25 : vector<1x64xf32>
    %cst_13 = arith.constant 9.99999974E-6 : f32
    %27 = vector.broadcast %cst_13 : f32 to vector<1x64xf32>
    %28 = arith.addf %26, %27 : vector<1x64xf32>
    %29 = math.rsqrt %28 : vector<1x64xf32>
    %30 = arith.mulf %11, %29 : vector<1x64xf32>
    %31 = arith.mulf %19, %30 : vector<1x64xf32>
    %32 = arith.subf %12, %31 : vector<1x64xf32>
    %33 = vector.broadcast %30 : vector<1x64xf32> to vector<32x64xf32>
    %34 = arith.mulf %10, %33 : vector<32x64xf32>
    %35 = vector.broadcast %32 : vector<1x64xf32> to vector<32x64xf32>
    %36 = arith.addf %34, %35 : vector<32x64xf32>
    %cst_14 = arith.constant 0.000000e+00 : f32
    %37 = vector.broadcast %cst_14 : f32 to vector<32x64xf32>
    %38 = arith.maximumf %36, %37 : vector<32x64xf32>
    %c1 = arith.constant 1 : index
    %c0_15 = arith.constant 0 : index
    %c0_16 = arith.constant 0 : index
    %39 = vector.load %arg7[%c1, %c0_15, %c0_16] : memref<8x2x64xf32, #tpu.memory_space<vmem>>, vector<1x2x64xf32>
    %40 = vector.shape_cast %39 : vector<1x2x64xf32> to vector<2x64xf32>
    %c0_17 = arith.constant 0 : index
    %c0_18 = arith.constant 0 : index
    %c0_19 = arith.constant 0 : index
    %41 = vector.load %arg6[%c0_17, %c0_18, %c0_19] : memref<6x64x64xf32, #tpu.memory_space<vmem>>, vector<1x64x64xf32>
    %42 = vector.shape_cast %41 : vector<1x64x64xf32> to vector<64x64xf32>
    %43 = arith.truncf %38 : vector<32x64xf32> to vector<32x64xbf16>
    %44 = arith.truncf %42 : vector<64x64xf32> to vector<64x64xbf16>
    %cst_20 = arith.constant dense<0.000000e+00> : vector<32x64xf32>
    %45 = tpu.matmul %43, %44, %cst_20 {dimension_numbers = #tpu.dot_dimension_numbers<[1], [0], [0], [1], [0, 0, 1, 1], [], []>} : vector<32x64xbf16>, vector<64x64xbf16>, vector<32x64xf32> -> vector<32x64xf32>
    %46 = arith.truncf %45 : vector<32x64xf32> to vector<32x64xbf16>
    %cst_21 = arith.constant dense<0.000000e+00> : vector<32x64xf32>
    %47 = tpu.matmul %1, %46, %cst_21 {dimension_numbers = #tpu.dot_dimension_numbers<[1], [0], [0], [1], [0, 0, 1, 1], [], []>} : vector<32x32xbf16>, vector<32x64xbf16>, vector<32x64xf32> -> vector<32x64xf32>
    %48 = vector.extract_strided_slice %40 {offsets = [0, 0], sizes = [1, 64], strides = [1, 1]} : vector<2x64xf32> to vector<1x64xf32>
    %49 = vector.extract_strided_slice %40 {offsets = [1, 0], sizes = [1, 64], strides = [1, 1]} : vector<2x64xf32> to vector<1x64xf32>
    %50 = arith.mulf %47, %47 : vector<32x64xf32>
    %51 = tpu.concatenate %47, %50 in 1 : vector<32x64xf32>, vector<32x64xf32> -> vector<32x128xf32>
    %cst_22 = arith.constant dense<0.000000e+00> : vector<128xf32>
    %52 = vector.multi_reduction <add>, %51, %cst_22 [0] : vector<32x128xf32> to vector<128xf32>
    %53 = vector.shape_cast %52 : vector<128xf32> to vector<1x128xf32>
    %54 = vector.extract_strided_slice %53 {offsets = [0, 0], sizes = [1, 64], strides = [1, 1]} : vector<1x128xf32> to vector<1x64xf32>
    %cst_23 = arith.constant 3.125000e-02 : f32
    %55 = vector.broadcast %cst_23 : f32 to vector<1x64xf32>
    %56 = arith.mulf %54, %55 : vector<1x64xf32>
    %57 = vector.extract_strided_slice %53 {offsets = [0, 64], sizes = [1, 64], strides = [1, 1]} : vector<1x128xf32> to vector<1x64xf32>
    %cst_24 = arith.constant 3.125000e-02 : f32
    %58 = vector.broadcast %cst_24 : f32 to vector<1x64xf32>
    %59 = arith.mulf %57, %58 : vector<1x64xf32>
    %60 = arith.mulf %56, %56 : vector<1x64xf32>
    %61 = arith.subf %59, %60 : vector<1x64xf32>
    %cst_25 = arith.constant 0.000000e+00 : f32
    %62 = vector.broadcast %cst_25 : f32 to vector<1x64xf32>
    %63 = arith.maximumf %61, %62 : vector<1x64xf32>
    %cst_26 = arith.constant 9.99999974E-6 : f32
    %64 = vector.broadcast %cst_26 : f32 to vector<1x64xf32>
    %65 = arith.addf %63, %64 : vector<1x64xf32>
    %66 = math.rsqrt %65 : vector<1x64xf32>
    %67 = arith.mulf %48, %66 : vector<1x64xf32>
    %68 = arith.mulf %56, %67 : vector<1x64xf32>
    %69 = arith.subf %49, %68 : vector<1x64xf32>
    %70 = vector.broadcast %67 : vector<1x64xf32> to vector<32x64xf32>
    %71 = arith.mulf %47, %70 : vector<32x64xf32>
    %72 = vector.broadcast %69 : vector<1x64xf32> to vector<32x64xf32>
    %73 = arith.addf %71, %72 : vector<32x64xf32>
    %cst_27 = arith.constant 0.000000e+00 : f32
    %74 = vector.broadcast %cst_27 : f32 to vector<32x64xf32>
    %75 = arith.maximumf %73, %74 : vector<32x64xf32>
    %c2 = arith.constant 2 : index
    %c0_28 = arith.constant 0 : index
    %c0_29 = arith.constant 0 : index
    %76 = vector.load %arg7[%c2, %c0_28, %c0_29] : memref<8x2x64xf32, #tpu.memory_space<vmem>>, vector<1x2x64xf32>
    %77 = vector.shape_cast %76 : vector<1x2x64xf32> to vector<2x64xf32>
    %c1_30 = arith.constant 1 : index
    %c0_31 = arith.constant 0 : index
    %c0_32 = arith.constant 0 : index
    %78 = vector.load %arg6[%c1_30, %c0_31, %c0_32] : memref<6x64x64xf32, #tpu.memory_space<vmem>>, vector<1x64x64xf32>
    %79 = vector.shape_cast %78 : vector<1x64x64xf32> to vector<64x64xf32>
    %80 = arith.truncf %75 : vector<32x64xf32> to vector<32x64xbf16>
    %81 = arith.truncf %79 : vector<64x64xf32> to vector<64x64xbf16>
    %cst_33 = arith.constant dense<0.000000e+00> : vector<32x64xf32>
    %82 = tpu.matmul %80, %81, %cst_33 {dimension_numbers = #tpu.dot_dimension_numbers<[1], [0], [0], [1], [0, 0, 1, 1], [], []>} : vector<32x64xbf16>, vector<64x64xbf16>, vector<32x64xf32> -> vector<32x64xf32>
    %83 = arith.truncf %82 : vector<32x64xf32> to vector<32x64xbf16>
    %cst_34 = arith.constant dense<0.000000e+00> : vector<32x64xf32>
    %84 = tpu.matmul %1, %83, %cst_34 {dimension_numbers = #tpu.dot_dimension_numbers<[1], [0], [0], [1], [0, 0, 1, 1], [], []>} : vector<32x32xbf16>, vector<32x64xbf16>, vector<32x64xf32> -> vector<32x64xf32>
    %85 = vector.extract_strided_slice %77 {offsets = [0, 0], sizes = [1, 64], strides = [1, 1]} : vector<2x64xf32> to vector<1x64xf32>
    %86 = vector.extract_strided_slice %77 {offsets = [1, 0], sizes = [1, 64], strides = [1, 1]} : vector<2x64xf32> to vector<1x64xf32>
    %87 = arith.mulf %84, %84 : vector<32x64xf32>
    %88 = tpu.concatenate %84, %87 in 1 : vector<32x64xf32>, vector<32x64xf32> -> vector<32x128xf32>
    %cst_35 = arith.constant dense<0.000000e+00> : vector<128xf32>
    %89 = vector.multi_reduction <add>, %88, %cst_35 [0] : vector<32x128xf32> to vector<128xf32>
    %90 = vector.shape_cast %89 : vector<128xf32> to vector<1x128xf32>
    %91 = vector.extract_strided_slice %90 {offsets = [0, 0], sizes = [1, 64], strides = [1, 1]} : vector<1x128xf32> to vector<1x64xf32>
    %cst_36 = arith.constant 3.125000e-02 : f32
    %92 = vector.broadcast %cst_36 : f32 to vector<1x64xf32>
    %93 = arith.mulf %91, %92 : vector<1x64xf32>
    %94 = vector.extract_strided_slice %90 {offsets = [0, 64], sizes = [1, 64], strides = [1, 1]} : vector<1x128xf32> to vector<1x64xf32>
    %cst_37 = arith.constant 3.125000e-02 : f32
    %95 = vector.broadcast %cst_37 : f32 to vector<1x64xf32>
    %96 = arith.mulf %94, %95 : vector<1x64xf32>
    %97 = arith.mulf %93, %93 : vector<1x64xf32>
    %98 = arith.subf %96, %97 : vector<1x64xf32>
    %cst_38 = arith.constant 0.000000e+00 : f32
    %99 = vector.broadcast %cst_38 : f32 to vector<1x64xf32>
    %100 = arith.maximumf %98, %99 : vector<1x64xf32>
    %cst_39 = arith.constant 9.99999974E-6 : f32
    %101 = vector.broadcast %cst_39 : f32 to vector<1x64xf32>
    %102 = arith.addf %100, %101 : vector<1x64xf32>
    %103 = math.rsqrt %102 : vector<1x64xf32>
    %104 = arith.mulf %85, %103 : vector<1x64xf32>
    %105 = arith.mulf %93, %104 : vector<1x64xf32>
    %106 = arith.subf %86, %105 : vector<1x64xf32>
    %107 = vector.broadcast %104 : vector<1x64xf32> to vector<32x64xf32>
    %108 = arith.mulf %84, %107 : vector<32x64xf32>
    %109 = vector.broadcast %106 : vector<1x64xf32> to vector<32x64xf32>
    %110 = arith.addf %108, %109 : vector<32x64xf32>
    %cst_40 = arith.constant 0.000000e+00 : f32
    %111 = vector.broadcast %cst_40 : f32 to vector<32x64xf32>
    %112 = arith.maximumf %110, %111 : vector<32x64xf32>
    %c3 = arith.constant 3 : index
    %c0_41 = arith.constant 0 : index
    %c0_42 = arith.constant 0 : index
    %113 = vector.load %arg7[%c3, %c0_41, %c0_42] : memref<8x2x64xf32, #tpu.memory_space<vmem>>, vector<1x2x64xf32>
    %114 = vector.shape_cast %113 : vector<1x2x64xf32> to vector<2x64xf32>
    %c2_43 = arith.constant 2 : index
    %c0_44 = arith.constant 0 : index
    %c0_45 = arith.constant 0 : index
    %115 = vector.load %arg6[%c2_43, %c0_44, %c0_45] : memref<6x64x64xf32, #tpu.memory_space<vmem>>, vector<1x64x64xf32>
    %116 = vector.shape_cast %115 : vector<1x64x64xf32> to vector<64x64xf32>
    %117 = arith.truncf %112 : vector<32x64xf32> to vector<32x64xbf16>
    %118 = arith.truncf %116 : vector<64x64xf32> to vector<64x64xbf16>
    %cst_46 = arith.constant dense<0.000000e+00> : vector<32x64xf32>
    %119 = tpu.matmul %117, %118, %cst_46 {dimension_numbers = #tpu.dot_dimension_numbers<[1], [0], [0], [1], [0, 0, 1, 1], [], []>} : vector<32x64xbf16>, vector<64x64xbf16>, vector<32x64xf32> -> vector<32x64xf32>
    %120 = arith.truncf %119 : vector<32x64xf32> to vector<32x64xbf16>
    %cst_47 = arith.constant dense<0.000000e+00> : vector<32x64xf32>
    %121 = tpu.matmul %1, %120, %cst_47 {dimension_numbers = #tpu.dot_dimension_numbers<[1], [0], [0], [1], [0, 0, 1, 1], [], []>} : vector<32x32xbf16>, vector<32x64xbf16>, vector<32x64xf32> -> vector<32x64xf32>
    %122 = vector.extract_strided_slice %114 {offsets = [0, 0], sizes = [1, 64], strides = [1, 1]} : vector<2x64xf32> to vector<1x64xf32>
    %123 = vector.extract_strided_slice %114 {offsets = [1, 0], sizes = [1, 64], strides = [1, 1]} : vector<2x64xf32> to vector<1x64xf32>
    %124 = arith.mulf %121, %121 : vector<32x64xf32>
    %125 = tpu.concatenate %121, %124 in 1 : vector<32x64xf32>, vector<32x64xf32> -> vector<32x128xf32>
    %cst_48 = arith.constant dense<0.000000e+00> : vector<128xf32>
    %126 = vector.multi_reduction <add>, %125, %cst_48 [0] : vector<32x128xf32> to vector<128xf32>
    %127 = vector.shape_cast %126 : vector<128xf32> to vector<1x128xf32>
    %128 = vector.extract_strided_slice %127 {offsets = [0, 0], sizes = [1, 64], strides = [1, 1]} : vector<1x128xf32> to vector<1x64xf32>
    %cst_49 = arith.constant 3.125000e-02 : f32
    %129 = vector.broadcast %cst_49 : f32 to vector<1x64xf32>
    %130 = arith.mulf %128, %129 : vector<1x64xf32>
    %131 = vector.extract_strided_slice %127 {offsets = [0, 64], sizes = [1, 64], strides = [1, 1]} : vector<1x128xf32> to vector<1x64xf32>
    %cst_50 = arith.constant 3.125000e-02 : f32
    %132 = vector.broadcast %cst_50 : f32 to vector<1x64xf32>
    %133 = arith.mulf %131, %132 : vector<1x64xf32>
    %134 = arith.mulf %130, %130 : vector<1x64xf32>
    %135 = arith.subf %133, %134 : vector<1x64xf32>
    %cst_51 = arith.constant 0.000000e+00 : f32
    %136 = vector.broadcast %cst_51 : f32 to vector<1x64xf32>
    %137 = arith.maximumf %135, %136 : vector<1x64xf32>
    %cst_52 = arith.constant 9.99999974E-6 : f32
    %138 = vector.broadcast %cst_52 : f32 to vector<1x64xf32>
    %139 = arith.addf %137, %138 : vector<1x64xf32>
    %140 = math.rsqrt %139 : vector<1x64xf32>
    %141 = arith.mulf %122, %140 : vector<1x64xf32>
    %142 = arith.mulf %130, %141 : vector<1x64xf32>
    %143 = arith.subf %123, %142 : vector<1x64xf32>
    %144 = vector.broadcast %141 : vector<1x64xf32> to vector<32x64xf32>
    %145 = arith.mulf %121, %144 : vector<32x64xf32>
    %146 = vector.broadcast %143 : vector<1x64xf32> to vector<32x64xf32>
    %147 = arith.addf %145, %146 : vector<32x64xf32>
    %cst_53 = arith.constant 0.000000e+00 : f32
    %148 = vector.broadcast %cst_53 : f32 to vector<32x64xf32>
    %149 = arith.maximumf %147, %148 : vector<32x64xf32>
    %150 = vector.extract_strided_slice %149 {offsets = [15, 0], sizes = [1, 64], strides = [1, 1]} : vector<32x64xf32> to vector<1x64xf32>
    %151 = vector.extract_strided_slice %149 {offsets = [31, 0], sizes = [1, 64], strides = [1, 1]} : vector<32x64xf32> to vector<1x64xf32>
    %152 = tpu.concatenate %150, %151 in 0 : vector<1x64xf32>, vector<1x64xf32> -> vector<2x64xf32>
    %c0_54 = arith.constant 0 : index
    %c0_55 = arith.constant 0 : index
    %153 = vector.load %arg3[%c0_54, %c0_55] : memref<16x16xf32, #tpu.memory_space<vmem>>, vector<16x16xf32>
    %154 = arith.truncf %153 : vector<16x16xf32> to vector<16x16xbf16>
    %c0_56 = arith.constant 0 : index
    %c0_57 = arith.constant 0 : index
    %155 = vector.load %arg2[%c0_56, %c0_57] : memref<16x8xf32, #tpu.memory_space<vmem>>, vector<16x8xf32>
    %156 = arith.truncf %155 : vector<16x8xf32> to vector<16x8xbf16>
    %c4 = arith.constant 4 : index
    %c0_58 = arith.constant 0 : index
    %c0_59 = arith.constant 0 : index
    %157 = vector.load %arg7[%c4, %c0_58, %c0_59] : memref<8x2x64xf32, #tpu.memory_space<vmem>>, vector<1x2x64xf32>
    %158 = vector.shape_cast %157 : vector<1x2x64xf32> to vector<2x64xf32>
    %c0_60 = arith.constant 0 : index
    %c0_61 = arith.constant 0 : index
    %159 = vector.load %arg5[%c0_60, %c0_61] : memref<8x64xf32, #tpu.memory_space<vmem>>, vector<8x64xf32>
    %cst_62 = arith.constant dense<0.000000e+00> : vector<16x8xf32>
    %160 = tpu.matmul %154, %156, %cst_62 {dimension_numbers = #tpu.dot_dimension_numbers<[1], [0], [0], [1], [0, 0, 1, 1], [], []>} : vector<16x16xbf16>, vector<16x8xbf16>, vector<16x8xf32> -> vector<16x8xf32>
    %161 = arith.truncf %160 : vector<16x8xf32> to vector<16x8xbf16>
    %162 = arith.truncf %159 : vector<8x64xf32> to vector<8x64xbf16>
    %cst_63 = arith.constant dense<0.000000e+00> : vector<16x64xf32>
    %163 = tpu.matmul %161, %162, %cst_63 {dimension_numbers = #tpu.dot_dimension_numbers<[1], [0], [0], [1], [0, 0, 1, 1], [], []>} : vector<16x8xbf16>, vector<8x64xbf16>, vector<16x64xf32> -> vector<16x64xf32>
    %164 = vector.extract_strided_slice %158 {offsets = [0, 0], sizes = [1, 64], strides = [1, 1]} : vector<2x64xf32> to vector<1x64xf32>
    %165 = vector.extract_strided_slice %158 {offsets = [1, 0], sizes = [1, 64], strides = [1, 1]} : vector<2x64xf32> to vector<1x64xf32>
    %166 = arith.mulf %163, %163 : vector<16x64xf32>
    %167 = tpu.concatenate %163, %166 in 1 : vector<16x64xf32>, vector<16x64xf32> -> vector<16x128xf32>
    %cst_64 = arith.constant dense<0.000000e+00> : vector<128xf32>
    %168 = vector.multi_reduction <add>, %167, %cst_64 [0] : vector<16x128xf32> to vector<128xf32>
    %169 = vector.shape_cast %168 : vector<128xf32> to vector<1x128xf32>
    %170 = vector.extract_strided_slice %169 {offsets = [0, 0], sizes = [1, 64], strides = [1, 1]} : vector<1x128xf32> to vector<1x64xf32>
    %cst_65 = arith.constant 6.250000e-02 : f32
    %171 = vector.broadcast %cst_65 : f32 to vector<1x64xf32>
    %172 = arith.mulf %170, %171 : vector<1x64xf32>
    %173 = vector.extract_strided_slice %169 {offsets = [0, 64], sizes = [1, 64], strides = [1, 1]} : vector<1x128xf32> to vector<1x64xf32>
    %cst_66 = arith.constant 6.250000e-02 : f32
    %174 = vector.broadcast %cst_66 : f32 to vector<1x64xf32>
    %175 = arith.mulf %173, %174 : vector<1x64xf32>
    %176 = arith.mulf %172, %172 : vector<1x64xf32>
    %177 = arith.subf %175, %176 : vector<1x64xf32>
    %cst_67 = arith.constant 0.000000e+00 : f32
    %178 = vector.broadcast %cst_67 : f32 to vector<1x64xf32>
    %179 = arith.maximumf %177, %178 : vector<1x64xf32>
    %cst_68 = arith.constant 9.99999974E-6 : f32
    %180 = vector.broadcast %cst_68 : f32 to vector<1x64xf32>
    %181 = arith.addf %179, %180 : vector<1x64xf32>
    %182 = math.rsqrt %181 : vector<1x64xf32>
    %183 = arith.mulf %164, %182 : vector<1x64xf32>
    %184 = arith.mulf %172, %183 : vector<1x64xf32>
    %185 = arith.subf %165, %184 : vector<1x64xf32>
    %186 = vector.broadcast %183 : vector<1x64xf32> to vector<16x64xf32>
    %187 = arith.mulf %163, %186 : vector<16x64xf32>
    %188 = vector.broadcast %185 : vector<1x64xf32> to vector<16x64xf32>
    %189 = arith.addf %187, %188 : vector<16x64xf32>
    %cst_69 = arith.constant 0.000000e+00 : f32
    %190 = vector.broadcast %cst_69 : f32 to vector<16x64xf32>
    %191 = arith.maximumf %189, %190 : vector<16x64xf32>
    %c5 = arith.constant 5 : index
    %c0_70 = arith.constant 0 : index
    %c0_71 = arith.constant 0 : index
    %192 = vector.load %arg7[%c5, %c0_70, %c0_71] : memref<8x2x64xf32, #tpu.memory_space<vmem>>, vector<1x2x64xf32>
    %193 = vector.shape_cast %192 : vector<1x2x64xf32> to vector<2x64xf32>
    %c3_72 = arith.constant 3 : index
    %c0_73 = arith.constant 0 : index
    %c0_74 = arith.constant 0 : index
    %194 = vector.load %arg6[%c3_72, %c0_73, %c0_74] : memref<6x64x64xf32, #tpu.memory_space<vmem>>, vector<1x64x64xf32>
    %195 = vector.shape_cast %194 : vector<1x64x64xf32> to vector<64x64xf32>
    %196 = arith.truncf %191 : vector<16x64xf32> to vector<16x64xbf16>
    %197 = arith.truncf %195 : vector<64x64xf32> to vector<64x64xbf16>
    %cst_75 = arith.constant dense<0.000000e+00> : vector<16x64xf32>
    %198 = tpu.matmul %196, %197, %cst_75 {dimension_numbers = #tpu.dot_dimension_numbers<[1], [0], [0], [1], [0, 0, 1, 1], [], []>} : vector<16x64xbf16>, vector<64x64xbf16>, vector<16x64xf32> -> vector<16x64xf32>
    %199 = arith.truncf %198 : vector<16x64xf32> to vector<16x64xbf16>
    %cst_76 = arith.constant dense<0.000000e+00> : vector<16x64xf32>
    %200 = tpu.matmul %154, %199, %cst_76 {dimension_numbers = #tpu.dot_dimension_numbers<[1], [0], [0], [1], [0, 0, 1, 1], [], []>} : vector<16x16xbf16>, vector<16x64xbf16>, vector<16x64xf32> -> vector<16x64xf32>
    %201 = vector.extract_strided_slice %193 {offsets = [0, 0], sizes = [1, 64], strides = [1, 1]} : vector<2x64xf32> to vector<1x64xf32>
    %202 = vector.extract_strided_slice %193 {offsets = [1, 0], sizes = [1, 64], strides = [1, 1]} : vector<2x64xf32> to vector<1x64xf32>
    %203 = arith.mulf %200, %200 : vector<16x64xf32>
    %204 = tpu.concatenate %200, %203 in 1 : vector<16x64xf32>, vector<16x64xf32> -> vector<16x128xf32>
    %cst_77 = arith.constant dense<0.000000e+00> : vector<128xf32>
    %205 = vector.multi_reduction <add>, %204, %cst_77 [0] : vector<16x128xf32> to vector<128xf32>
    %206 = vector.shape_cast %205 : vector<128xf32> to vector<1x128xf32>
    %207 = vector.extract_strided_slice %206 {offsets = [0, 0], sizes = [1, 64], strides = [1, 1]} : vector<1x128xf32> to vector<1x64xf32>
    %cst_78 = arith.constant 6.250000e-02 : f32
    %208 = vector.broadcast %cst_78 : f32 to vector<1x64xf32>
    %209 = arith.mulf %207, %208 : vector<1x64xf32>
    %210 = vector.extract_strided_slice %206 {offsets = [0, 64], sizes = [1, 64], strides = [1, 1]} : vector<1x128xf32> to vector<1x64xf32>
    %cst_79 = arith.constant 6.250000e-02 : f32
    %211 = vector.broadcast %cst_79 : f32 to vector<1x64xf32>
    %212 = arith.mulf %210, %211 : vector<1x64xf32>
    %213 = arith.mulf %209, %209 : vector<1x64xf32>
    %214 = arith.subf %212, %213 : vector<1x64xf32>
    %cst_80 = arith.constant 0.000000e+00 : f32
    %215 = vector.broadcast %cst_80 : f32 to vector<1x64xf32>
    %216 = arith.maximumf %214, %215 : vector<1x64xf32>
    %cst_81 = arith.constant 9.99999974E-6 : f32
    %217 = vector.broadcast %cst_81 : f32 to vector<1x64xf32>
    %218 = arith.addf %216, %217 : vector<1x64xf32>
    %219 = math.rsqrt %218 : vector<1x64xf32>
    %220 = arith.mulf %201, %219 : vector<1x64xf32>
    %221 = arith.mulf %209, %220 : vector<1x64xf32>
    %222 = arith.subf %202, %221 : vector<1x64xf32>
    %223 = vector.broadcast %220 : vector<1x64xf32> to vector<16x64xf32>
    %224 = arith.mulf %200, %223 : vector<16x64xf32>
    %225 = vector.broadcast %222 : vector<1x64xf32> to vector<16x64xf32>
    %226 = arith.addf %224, %225 : vector<16x64xf32>
    %cst_82 = arith.constant 0.000000e+00 : f32
    %227 = vector.broadcast %cst_82 : f32 to vector<16x64xf32>
    %228 = arith.maximumf %226, %227 : vector<16x64xf32>
    %c6 = arith.constant 6 : index
    %c0_83 = arith.constant 0 : index
    %c0_84 = arith.constant 0 : index
    %229 = vector.load %arg7[%c6, %c0_83, %c0_84] : memref<8x2x64xf32, #tpu.memory_space<vmem>>, vector<1x2x64xf32>
    %230 = vector.shape_cast %229 : vector<1x2x64xf32> to vector<2x64xf32>
    %c4_85 = arith.constant 4 : index
    %c0_86 = arith.constant 0 : index
    %c0_87 = arith.constant 0 : index
    %231 = vector.load %arg6[%c4_85, %c0_86, %c0_87] : memref<6x64x64xf32, #tpu.memory_space<vmem>>, vector<1x64x64xf32>
    %232 = vector.shape_cast %231 : vector<1x64x64xf32> to vector<64x64xf32>
    %233 = arith.truncf %228 : vector<16x64xf32> to vector<16x64xbf16>
    %234 = arith.truncf %232 : vector<64x64xf32> to vector<64x64xbf16>
    %cst_88 = arith.constant dense<0.000000e+00> : vector<16x64xf32>
    %235 = tpu.matmul %233, %234, %cst_88 {dimension_numbers = #tpu.dot_dimension_numbers<[1], [0], [0], [1], [0, 0, 1, 1], [], []>} : vector<16x64xbf16>, vector<64x64xbf16>, vector<16x64xf32> -> vector<16x64xf32>
    %236 = arith.truncf %235 : vector<16x64xf32> to vector<16x64xbf16>
    %cst_89 = arith.constant dense<0.000000e+00> : vector<16x64xf32>
    %237 = tpu.matmul %154, %236, %cst_89 {dimension_numbers = #tpu.dot_dimension_numbers<[1], [0], [0], [1], [0, 0, 1, 1], [], []>} : vector<16x16xbf16>, vector<16x64xbf16>, vector<16x64xf32> -> vector<16x64xf32>
    %238 = vector.extract_strided_slice %230 {offsets = [0, 0], sizes = [1, 64], strides = [1, 1]} : vector<2x64xf32> to vector<1x64xf32>
    %239 = vector.extract_strided_slice %230 {offsets = [1, 0], sizes = [1, 64], strides = [1, 1]} : vector<2x64xf32> to vector<1x64xf32>
    %240 = arith.mulf %237, %237 : vector<16x64xf32>
    %241 = tpu.concatenate %237, %240 in 1 : vector<16x64xf32>, vector<16x64xf32> -> vector<16x128xf32>
    %cst_90 = arith.constant dense<0.000000e+00> : vector<128xf32>
    %242 = vector.multi_reduction <add>, %241, %cst_90 [0] : vector<16x128xf32> to vector<128xf32>
    %243 = vector.shape_cast %242 : vector<128xf32> to vector<1x128xf32>
    %244 = vector.extract_strided_slice %243 {offsets = [0, 0], sizes = [1, 64], strides = [1, 1]} : vector<1x128xf32> to vector<1x64xf32>
    %cst_91 = arith.constant 6.250000e-02 : f32
    %245 = vector.broadcast %cst_91 : f32 to vector<1x64xf32>
    %246 = arith.mulf %244, %245 : vector<1x64xf32>
    %247 = vector.extract_strided_slice %243 {offsets = [0, 64], sizes = [1, 64], strides = [1, 1]} : vector<1x128xf32> to vector<1x64xf32>
    %cst_92 = arith.constant 6.250000e-02 : f32
    %248 = vector.broadcast %cst_92 : f32 to vector<1x64xf32>
    %249 = arith.mulf %247, %248 : vector<1x64xf32>
    %250 = arith.mulf %246, %246 : vector<1x64xf32>
    %251 = arith.subf %249, %250 : vector<1x64xf32>
    %cst_93 = arith.constant 0.000000e+00 : f32
    %252 = vector.broadcast %cst_93 : f32 to vector<1x64xf32>
    %253 = arith.maximumf %251, %252 : vector<1x64xf32>
    %cst_94 = arith.constant 9.99999974E-6 : f32
    %254 = vector.broadcast %cst_94 : f32 to vector<1x64xf32>
    %255 = arith.addf %253, %254 : vector<1x64xf32>
    %256 = math.rsqrt %255 : vector<1x64xf32>
    %257 = arith.mulf %238, %256 : vector<1x64xf32>
    %258 = arith.mulf %246, %257 : vector<1x64xf32>
    %259 = arith.subf %239, %258 : vector<1x64xf32>
    %260 = vector.broadcast %257 : vector<1x64xf32> to vector<16x64xf32>
    %261 = arith.mulf %237, %260 : vector<16x64xf32>
    %262 = vector.broadcast %259 : vector<1x64xf32> to vector<16x64xf32>
    %263 = arith.addf %261, %262 : vector<16x64xf32>
    %cst_95 = arith.constant 0.000000e+00 : f32
    %264 = vector.broadcast %cst_95 : f32 to vector<16x64xf32>
    %265 = arith.maximumf %263, %264 : vector<16x64xf32>
    %c7 = arith.constant 7 : index
    %c0_96 = arith.constant 0 : index
    %c0_97 = arith.constant 0 : index
    %266 = vector.load %arg7[%c7, %c0_96, %c0_97] : memref<8x2x64xf32, #tpu.memory_space<vmem>>, vector<1x2x64xf32>
    %267 = vector.shape_cast %266 : vector<1x2x64xf32> to vector<2x64xf32>
    %c5_98 = arith.constant 5 : index
    %c0_99 = arith.constant 0 : index
    %c0_100 = arith.constant 0 : index
    %268 = vector.load %arg6[%c5_98, %c0_99, %c0_100] : memref<6x64x64xf32, #tpu.memory_space<vmem>>, vector<1x64x64xf32>
    %269 = vector.shape_cast %268 : vector<1x64x64xf32> to vector<64x64xf32>
    %270 = arith.truncf %265 : vector<16x64xf32> to vector<16x64xbf16>
    %271 = arith.truncf %269 : vector<64x64xf32> to vector<64x64xbf16>
    %cst_101 = arith.constant dense<0.000000e+00> : vector<16x64xf32>
    %272 = tpu.matmul %270, %271, %cst_101 {dimension_numbers = #tpu.dot_dimension_numbers<[1], [0], [0], [1], [0, 0, 1, 1], [], []>} : vector<16x64xbf16>, vector<64x64xbf16>, vector<16x64xf32> -> vector<16x64xf32>
    %273 = arith.truncf %272 : vector<16x64xf32> to vector<16x64xbf16>
    %cst_102 = arith.constant dense<0.000000e+00> : vector<16x64xf32>
    %274 = tpu.matmul %154, %273, %cst_102 {dimension_numbers = #tpu.dot_dimension_numbers<[1], [0], [0], [1], [0, 0, 1, 1], [], []>} : vector<16x16xbf16>, vector<16x64xbf16>, vector<16x64xf32> -> vector<16x64xf32>
    %275 = vector.extract_strided_slice %267 {offsets = [0, 0], sizes = [1, 64], strides = [1, 1]} : vector<2x64xf32> to vector<1x64xf32>
    %276 = vector.extract_strided_slice %267 {offsets = [1, 0], sizes = [1, 64], strides = [1, 1]} : vector<2x64xf32> to vector<1x64xf32>
    %277 = arith.mulf %274, %274 : vector<16x64xf32>
    %278 = tpu.concatenate %274, %277 in 1 : vector<16x64xf32>, vector<16x64xf32> -> vector<16x128xf32>
    %cst_103 = arith.constant dense<0.000000e+00> : vector<128xf32>
    %279 = vector.multi_reduction <add>, %278, %cst_103 [0] : vector<16x128xf32> to vector<128xf32>
    %280 = vector.shape_cast %279 : vector<128xf32> to vector<1x128xf32>
    %281 = vector.extract_strided_slice %280 {offsets = [0, 0], sizes = [1, 64], strides = [1, 1]} : vector<1x128xf32> to vector<1x64xf32>
    %cst_104 = arith.constant 6.250000e-02 : f32
    %282 = vector.broadcast %cst_104 : f32 to vector<1x64xf32>
    %283 = arith.mulf %281, %282 : vector<1x64xf32>
    %284 = vector.extract_strided_slice %280 {offsets = [0, 64], sizes = [1, 64], strides = [1, 1]} : vector<1x128xf32> to vector<1x64xf32>
    %cst_105 = arith.constant 6.250000e-02 : f32
    %285 = vector.broadcast %cst_105 : f32 to vector<1x64xf32>
    %286 = arith.mulf %284, %285 : vector<1x64xf32>
    %287 = arith.mulf %283, %283 : vector<1x64xf32>
    %288 = arith.subf %286, %287 : vector<1x64xf32>
    %cst_106 = arith.constant 0.000000e+00 : f32
    %289 = vector.broadcast %cst_106 : f32 to vector<1x64xf32>
    %290 = arith.maximumf %288, %289 : vector<1x64xf32>
    %cst_107 = arith.constant 9.99999974E-6 : f32
    %291 = vector.broadcast %cst_107 : f32 to vector<1x64xf32>
    %292 = arith.addf %290, %291 : vector<1x64xf32>
    %293 = math.rsqrt %292 : vector<1x64xf32>
    %294 = arith.mulf %275, %293 : vector<1x64xf32>
    %295 = arith.mulf %283, %294 : vector<1x64xf32>
    %296 = arith.subf %276, %295 : vector<1x64xf32>
    %297 = vector.broadcast %294 : vector<1x64xf32> to vector<16x64xf32>
    %298 = arith.mulf %274, %297 : vector<16x64xf32>
    %299 = vector.broadcast %296 : vector<1x64xf32> to vector<16x64xf32>
    %300 = arith.addf %298, %299 : vector<16x64xf32>
    %cst_108 = arith.constant 0.000000e+00 : f32
    %301 = vector.broadcast %cst_108 : f32 to vector<16x64xf32>
    %302 = arith.maximumf %300, %301 : vector<16x64xf32>
    %303 = vector.extract_strided_slice %302 {offsets = [7, 0], sizes = [1, 64], strides = [1, 1]} : vector<16x64xf32> to vector<1x64xf32>
    %304 = vector.extract_strided_slice %302 {offsets = [15, 0], sizes = [1, 64], strides = [1, 1]} : vector<16x64xf32> to vector<1x64xf32>
    %305 = tpu.concatenate %303, %304 in 0 : vector<1x64xf32>, vector<1x64xf32> -> vector<2x64xf32>
    %306 = tpu.concatenate %152, %305 in 1 : vector<2x64xf32>, vector<2x64xf32> -> vector<2x128xf32>
    %c0_109 = arith.constant 0 : index
    %c0_110 = arith.constant 0 : index
    %307 = vector.load %arg9[%c0_109, %c0_110] : memref<2x128xf32, #tpu.memory_space<vmem>>, vector<2x128xf32>
    tpu.vector_store %arg9[%c0_109, %c0_110], %306 {strides = array<i32>} : memref<2x128xf32, #tpu.memory_space<vmem>>, vector<2x128xf32>,
    %c0_111 = arith.constant 0 : index
    %c0_112 = arith.constant 0 : index
    %308 = vector.load %arg8[%c0_111, %c0_112] : memref<2x128xf32, #tpu.memory_space<vmem>>, vector<1x128xf32>
    %c1_113 = arith.constant 1 : index
    %c0_114 = arith.constant 0 : index
    %309 = vector.load %arg8[%c1_113, %c0_114] : memref<2x128xf32, #tpu.memory_space<vmem>>, vector<1x1xf32>
    %310 = vector.broadcast %308 : vector<1x128xf32> to vector<2x128xf32>
    %311 = arith.mulf %306, %310 : vector<2x128xf32>
    %cst_115 = arith.constant dense<0.000000e+00> : vector<2xf32>
    %312 = vector.multi_reduction <add>, %311, %cst_115 [1] : vector<2x128xf32> to vector<2xf32>
    %313 = vector.shape_cast %312 : vector<2xf32> to vector<2x1xf32>
    %314 = vector.broadcast %309 : vector<1x1xf32> to vector<2x1xf32>
    %315 = arith.addf %313, %314 : vector<2x1xf32>
    %316 = arith.negf %315 : vector<2x1xf32>
    %317 = math.exp %316 : vector<2x1xf32>
    %cst_116 = arith.constant 1.000000e+00 : f32
    %318 = vector.broadcast %cst_116 : f32 to vector<2x1xf32>
    %319 = arith.addf %318, %317 : vector<2x1xf32>
    %320 = arith.divf %318, %319 : vector<2x1xf32>
    %c0_117 = arith.constant 0 : index
    %c0_118 = arith.constant 0 : index
    %321 = vector.load %arg10[%c0_117, %c0_118] : memref<2x1xf32, #tpu.memory_space<vmem>>, vector<2x1xf32>
    tpu.vector_store %arg10[%c0_117, %c0_118], %320 {strides = array<i32>} : memref<2x1xf32, #tpu.memory_space<vmem>>, vector<2x1xf32>,
    return
  }
}

</mosaic_0001>

<bundles_post_ra>
// kernel: gcn_forward.1
= control target key start
LH: loop header
LB: loop body
LE: loop exit
PB: predicated region body
PF: predicated region fallthrough
CT: control target
= control target key end

     0   :  { %16 = vsyncpa [#allocation3], 0  ;;  %s2262_s0 = inlined_call_operand.vmem [shape: f32[32,16], index: 0, kind: input, shape index: {}]   ;;  %s2263_s1 = inlined_call_operand.vmem [shape: f32[32,32], index: 1, kind: input, shape index: {}]   ;;  %s2264_s2 = inlined_call_operand.vmem [shape: f32[16,8], index: 2, kind: input, shape index: {}]   ;;  %s2265_s3 = inlined_call_operand.vmem [shape: f32[16,16], index: 3, kind: input, shape index: {}]   ;;  %s2266_s4 = inlined_call_operand.vmem [shape: f32[16,64], index: 4, kind: input, shape index: {}]   ;;  %s2267_s5 = inlined_call_operand.vmem [shape: f32[8,64], index: 5, kind: input, shape index: {}]   ;;  %s2268_s6 = inlined_call_operand.hbm [shape: f32[6,64,64], index: 6, kind: input, shape index: {}]   ;;  %s2269_s7 = inlined_call_operand.vmem [shape: f32[8,2,64], index: 7, kind: input, shape index: {}]   ;;  %s2270_s8 = inlined_call_operand.vmem [shape: f32[2,128], index: 8, kind: input, shape index: {}]   ;;  %s2271_s9 = inlined_call_operand.hbm [shape: f32[2,128], index: 9, kind: output, shape index: {0}]   ;;  %s2272_s10 = inlined_call_operand.vmem [shape: f32[2,1], index: 10, kind: output, shape index: {1}]  }
   0x1   :  { %17 = vsyncpa [#allocation4], 0  ;;  %s1832_s13 = smov [#allocation2]   ;;  %s1784_s17 = scalar_lea.hbm %s2268_s6, 6144 }
   0x2   :  { %s35_s14 = sshll.u32 %s1832_s13, 4  ;;  %p1785_p0 = scmp.ne.s32.totalorder %s2268_s6, %s1784_s17  ;;  %s36_s14 = int_to_ptr.vmem [resolvable:$true] %s35_s14 }
   0x3   :  { %p1788_p1 = scmp.lt.u32.totalorder %s1784_s17, %s2268_s6 }
   0x5   :  { %p1790_p2 = pnand %p1788_p1, %p1785_p0 }
   0x7   :  { %1793 = shalt.err (!%p1790_p2)
}
   0x8   :  { %s1794_s22 = scalar_lea.vmem %s36_s14, 6144  ;;  %p1799_p4 = scmp.lt.s32.totalorder %s36_s14, %s36_s14 }
   0x9   :  { %p1795_p3 = scmp.ne.s32.totalorder %s36_s14, %s1794_s22  ;;  %p1800_p5 = scmp.lt.s32.totalorder %s1794_s22, %s1794_s22 }
   0xb   :  { %p1801_p6 = por %p1800_p5, %p1799_p4 }
   0xd   :  { %p1802_p7 = pnand %p1801_p6, %p1795_p3 }
   0xf   :  { %1805 = shalt.err (!%p1802_p7)
}
  0x10   :  { %s1833_s23 = smov 128   ;;  %s1834_s24 = smov 8  }
  0x11   :  { %41 = dma.hbm_to_vmem [thread:$0]  %s2268_s6, 6144, %s36_s14, [#allocation3], %s1833_s23, %s1833_s23, %s1834_s24  }
  0x12   :  { %1828 = dma.done.wait [#allocation3], 6144  }
  0x13   :  { %1829 = vsyncadd [#allocation3], 4294961152  ;;  %v56_v0 = vld [vmem:[%s2262_s0] sm:$0xff]  ;;  %v57_v1 = vld [vmem:[%s2262_s0 + $0x8] sm:$0xff]  ;;  %vm65_vm0 = vcmask 261120   ;;  %vm124_vm1 = vcmask 130048  }
  0x14   :  { %v58_v2 = vld [vmem:[%s2262_s0 + $0x10] sm:$0xff]  ;;  %v60_v3 = vpack.c.bf16 %v57_v1, %v56_v0  ;;  %v59_v4 = vld [vmem:[%s2262_s0 + $0x18] sm:$0xff]  ;;  %v50_v5 = vld [vmem:[%s2263_s1] sm:$0xff]  ;;  %vm200_vm2 = vcmask 523264   ;;  %v234_v1 = vlaneseq  ;;  %vm1837_vm3 = vmmov 0   ;;  %s1838_s25 = smov [#allocation5]  }
  0x15   :  { %v51_v6 = vld [vmem:[%s2263_s1 + $0x8] sm:$0xff]  ;;  %v61_v7 = vpack.c.bf16 %v59_v4, %v58_v2  ;;  %v52_v9 = vld [vmem:[%s2263_s1 + $0x10] sm:$0xff]  ;;  %v53_v10 = vld [vmem:[%s2263_s1 + $0x18] sm:$0xff]  ;;  %s1835_s1 = smov 64   ;;  %vm902_vm4 = vcmask 1043456   ;;  %vm898_vm5 = vcmask 64512  }
  0x16   :  { %v1924_v8 = vpack.c.bf16 %v51_v6, %v50_v5  ;;  %1617 = vmatprep.subr.bf16.mxu0 %v60_v3  ;;  %v1934_v11 = vpack.c.bf16 %v53_v10, %v52_v9  ;;  %v63_v12 = vld [vmem:[%s2266_s4] sm:$0xff]  ;;  %v64_v13 = vld [vmem:[%s2266_s4 + $0x8] sm:$0xff]  ;;  %v258_v55 = vld [vmem:[#allocation2 + $0x10] sm:$0xff]  ;;  %v235_v2 = vshrl.u32 %v234_v1, 7  ;;  %vm841_vm6 = vcmask 1040384   ;;  %s1508_s26 = sshll.u32 %s1838_s25, 4  ;;  %s1509_s26 = int_to_ptr.vmem [resolvable:$true] %s1508_s26 }
  0x17   :  { %1618 = vmatpush3.bf16.msra.mxu0 %v60_v3  ;;  %v123_v14 = vpack.c.bf16 %v64_v13, %v63_v12  ;;  %v256_v51 = vld [vmem:[#allocation2] sm:$0xff]  ;;  %v257_v52 = vld [vmem:[#allocation2 + $0x8] sm:$0xff]  ;;  %v259_v56 = vld [vmem:[#allocation2 + $0x18] sm:$0xff]  ;;  %vm1485_vm7 = vcmask 1041408   ;;  %p1811_p9 = scmp.lt.s32.totalorder %s1509_s26, %s1509_s26 }
  0x18   :  { %1621 = vmatprep.mubr.msk.bf16.mxu0 %vm65_vm0, %v1924_v8  ;;  %1619 = vmatprep.subr.bf16.mxu0 %v61_v7  ;;  %v266_v54 = vpack.c.bf16 %v257_v52, %v256_v51  ;;  %v267_v57 = vpack.c.bf16 %v259_v56, %v258_v55  ;;  %v260_v58 = vld [vmem:[#allocation2 + $0x20] sm:$0xff]  ;;  %v261_v59 = vld [vmem:[#allocation2 + $0x28] sm:$0xff]  ;;  %v262_v61 = vld [vmem:[#allocation2 + $0x30] sm:$0xff]  ;;  %v1981_v4 = vsub.s32 0, %v235_v2  ;;  %v1984_v10 = vsub.s32 1, %v235_v2 }
  0x19   :  { %1625 = vmatprep.subr.bf16.mxu1 %v123_v14  ;;  %v268_v60 = vpack.c.bf16 %v261_v59, %v260_v58  ;;  %v263_v62 = vld [vmem:[#allocation2 + $0x38] sm:$0xff]  ;;  %v62_v3 = vld [vmem:[%s2269_s7] sm:$0x3]  ;;  %v453_v2 = vld [vmem:[#allocation2 + $0x48] sm:$0xff] }
  0x1a   :  { %1626 = vmatpush3.bf16.msra.mxu1 %v123_v14  ;;  %v269_v0 = vpack.c.bf16 %v263_v62, %v262_v61  ;;  %v452_v1 = vld [vmem:[#allocation2 + $0x40] sm:$0xff] }
  0x1b   :  { %1620 = vmatpush3.bf16.msra.mxu0 %v61_v7  ;;  %1631 = vmatprep.subr.bf16.mxu1 %v266_v54 }
  0x1e   :  { %1622 = vmatmul.mubr.msk.bf16.vlgmr.msra.gmra.mrb[0].mxu0 %vm65_vm0, %v1934_v11 }
  0x1f   :  { %1647 = vmatprep.mubr.msk.bf16.mxu0 %vm65_vm0, %v1924_v8 }
  0xf1   :  { %v1623_v15 = vpop.f32.mrb[0].mxu0 }
  0xf2   :  { %v106_v16 = vpop.f32.mrb[1].mxu0 }
  0xf3   :  { %v1624_v17 = vpop.f32.mrb[2].mxu0 }
  0xf4   :  { %v122_v18 = vpack.c.bf16 %v1624_v17, %v1623_v15  ;;  %v109_v19 = vpop.f32.mrb[3].mxu0 }
  0xf5   :  { %v121_v20 = vpack.c.bf16 %v109_v19, %v106_v16 }
  0xf7   :  { %1627 = vmatprep.mubr.msk.bf16.mxu1 %vm124_vm1, %v121_v20 }
  0xf8   :  { %1628 = vmatmul.mubr.msk.bf16.vlgmr.msra.gmra.mrb[0].mxu1 %vm124_vm1, %v122_v18 }
  0xf9   :  { %1632 = vmatpush3.bf16.msra.mxu1 %v266_v54 }
  0xfa   :  { %1633 = vmatprep.subr.bf16.mxu1 %v267_v57 }
  0xfd   :  { %1634 = vmatpush3.bf16.msra.mxu1 %v267_v57 }
  0xfe   :  { %1635 = vmatprep.subr.bf16.mxu1 %v268_v60 }
 0x101   :  { %1636 = vmatpush3.bf16.msra.mxu1 %v268_v60 }
 0x102   :  { %1637 = vmatprep.subr.bf16.mxu1 %v269_v0 }
 0x105   :  { %1638 = vmatpush3.bf16.msra.mxu1 %v269_v0 }
 0x1cb   :  { %v1948_v21 = vpop.f32.mrb[0].mxu1 }
 0x1cc   :  { %v1950_v22 = vpop.f32.mrb[1].mxu1  ;;  %v182_v23 = vmul.f32 %v1948_v21, %v1948_v21 }
 0x1cd   :  { %v1954_v24 = vpop.f32.mrb[2].mxu1  ;;  %v180_v25 = vmul.f32 %v1950_v22, %v1950_v22 }
 0x1ce   :  { %192 = vrot.lane.b32.xlu1 %v182_v23, %s1835_s1  ;;  %v1959_v26 = vpop.f32.mrb[3].mxu1  ;;  %v183_v27 = vmul.f32 %v1954_v24, %v1954_v24 }
 0x1cf   :  { %188 = vrot.lane.b32.xlu0 %v180_v25, %s1835_s1  ;;  %v181_v28 = vmul.f32 %v1959_v26, %v1959_v26 }
 0x1d2   :  { %194 = vrot.lane.b32.xlu1 %v183_v27, %s1835_s1 }
 0x1d3   :  { %190 = vrot.lane.b32.xlu0 %v181_v28, %s1835_s1 }
 0x240   :  { %v193_v29 = vpop.permute.xlu1 %192 }
 0x241   :  { %v189_v30 = vpop.permute.xlu0 %188  ;;  %v203_v36 = vsel %vm200_vm2, %v1948_v21, %v193_v29 }
 0x242   :  { %v201_v32 = vsel %vm200_vm2, %v1950_v22, %v189_v30 }
 0x244   :  { %v195_v34 = vpop.permute.xlu1 %194 }
 0x245   :  { %v191_v31 = vpop.permute.xlu0 %190  ;;  %v204_v38 = vsel %vm200_vm2, %v1954_v24, %v195_v34 }
 0x246   :  { %v202_v33 = vsel %vm200_vm2, %v1959_v26, %v191_v31 }
 0x247   :  { %v205_v35 = vadd.f32 %v202_v33, %v201_v32 }
 0x249   :  { %v206_v37 = vadd.f32 %v205_v35, %v203_v36 }
 0x24b   :  { %v207_v39 = vadd.f32 %v206_v37, %v204_v38 }
 0x24d   :  { %v208_v40 = vrot.slane %v207_v39, 4 }
 0x24f   :  { %v209_v41 = vadd.f32 %v208_v40, %v207_v39 }
 0x251   :  { %v210_v42 = vrot.slane %v209_v41, 2 }
 0x253   :  { %v211_v43 = vadd.f32 %v210_v42, %v209_v41 }
 0x255   :  { %v212_v44 = vrot.slane %v211_v43, 1 }
 0x257   :  { %v213_v45 = vadd.f32 %v212_v44, %v211_v43 }
 0x259   :  { %v214_v46 = vmul.f32 0.03125, %v213_v45 }
 0x25b   :  { %v215_v47 = vmul.f32 %v214_v46, %v214_v46 }
 0x25d   :  { %217 = vrot.lane.b32.xlu0 %v215_v47, %s1835_s1 }
 0x2cf   :  { %v218_v48 = vpop.permute.xlu0 %217 }
 0x2d0   :  { %v220_v49 = vsub.f32 %v214_v46, %v218_v48 }
 0x2d2   :  { %v221_v50 = vmax.f32 %v220_v49, 0.0 }
 0x2d4   :  { %v222_v53 = vadd.f32 1e-05, %v221_v50 }
 0x2d6   :  { %1764 = vrsqrt.f32 %v222_v53 }
 0x2e0   :  { %v1765_v63 = vpop.eup %1764 }
 0x2e1   :  { %225 = vrot.lane.b32.xlu1 %v1765_v63, %s1835_s1 }
 0x353   :  { %v226_v5 = vpop.permute.xlu1 %225 }
 0x354   :  { %v228_v6 = vmul.f32 %v226_v5, %v62_v3  ;;  %v462_v5 = vpack.c.bf16 %v453_v2, %v452_v1 }
 0x356   :  { %v229_v7 = vmul.f32 %v228_v6, %v214_v46  ;;  %v237_v9 = vrot.slane %v228_v6, %v1981_v4  ;;  %v454_v6 = vld [vmem:[#allocation2 + $0x50] sm:$0xff] }
 0x358   :  { %v231_v12 = vrot.slane %v229_v7, 7  ;;  %v238_v14 = vmul.f32 %v237_v9, %v1950_v22  ;;  %v239_v15 = vmul.f32 %v237_v9, %v1959_v26  ;;  %v240_v16 = vmul.f32 %v1948_v21, %v237_v9  ;;  %v455_v7 = vld [vmem:[#allocation2 + $0x58] sm:$0xff] }
 0x359   :  { %v241_v17 = vmul.f32 %v1954_v24, %v237_v9  ;;  %v463_v9 = vpack.c.bf16 %v455_v7, %v454_v6 }
 0x35a   :  { %v233_v13 = vsub.f32 %v62_v3, %v231_v12  ;;  %v456_v12 = vld [vmem:[#allocation2 + $0x60] sm:$0xff] }
 0x35c   :  { %v245_v18 = vrot.slane %v233_v13, %v1984_v10  ;;  %v457_v13 = vld [vmem:[#allocation2 + $0x68] sm:$0xff] }
 0x35e   :  { %v248_v19 = vadd.f32 %v245_v18, %v240_v16  ;;  %v249_v20 = vadd.f32 %v245_v18, %v241_v17  ;;  %v246_v23 = vadd.f32 %v245_v18, %v238_v14  ;;  %v247_v25 = vadd.f32 %v245_v18, %v239_v15  ;;  %v458_v15 = vld [vmem:[#allocation2 + $0x70] sm:$0xff]  ;;  %v459_v16 = vld [vmem:[#allocation2 + $0x78] sm:$0xff] }
 0x35f   :  { %v464_v14 = vpack.c.bf16 %v457_v13, %v456_v12  ;;  %v465_v18 = vpack.c.bf16 %v459_v16, %v458_v15  ;;  %v648_v16 = vld [vmem:[#allocation2 + $0x80] sm:$0xff] }
 0x360   :  { %v252_v27 = vmax.f32 %v248_v19, 0.0  ;;  %v253_v28 = vmax.f32 %v249_v20, 0.0  ;;  %v250_v29 = vmax.f32 %v246_v23, 0.0  ;;  %v251_v30 = vmax.f32 %v247_v25, 0.0  ;;  %v1525_v19 = vld [vmem:[%s2269_s7 + $0x2] sm:$0x3] }
 0x362   :  { %v264_v31 = vpack.c.bf16 %v251_v30, %v250_v29  ;;  %v265_v32 = vpack.c.bf16 %v253_v28, %v252_v27 }
 0x364   :  { %1639 = vmatprep.mubr.msk.bf16.mxu1 %vm200_vm2, %v264_v31 }
 0x365   :  { %1640 = vmatmul.mubr.msk.bf16.vlgmr.msra.gmra.mrb[4].mxu1 %vm200_vm2, %v265_v32 }
 0x366   :  { %1667 = vmatprep.mubr.msk.bf16.mxu1 %vm65_vm0, %v1924_v8 }
 0x438   :  { %v1641_v21 = vpop.f32.mrb[4].mxu1 }
 0x439   :  { %v310_v22 = vpop.f32.mrb[5].mxu1 }
 0x43a   :  { %v1642_v24 = vpop.f32.mrb[6].mxu1 }
 0x43b   :  { %v326_v26 = vpack.c.bf16 %v1642_v24, %v1641_v21  ;;  %v313_v33 = vpop.f32.mrb[7].mxu1 }
 0x43c   :  { %v325_v34 = vpack.c.bf16 %v313_v33, %v310_v22 }
 0x43e   :  { %1643 = vmatprep.subr.bf16.mxu0 %v325_v34 }
 0x43f   :  { %1644 = vmatpush3.bf16.msra.mxu0 %v325_v34 }
 0x440   :  { %1645 = vmatprep.subr.bf16.mxu0 %v326_v26 }
 0x443   :  { %1646 = vmatpush3.bf16.msra.mxu0 %v326_v26 }
 0x444   :  { %1651 = vmatprep.subr.bf16.mxu0 %v462_v5 }
 0x446   :  { %1648 = vmatmul.mubr.msk.bf16.vlgmr.msra.gmra.mrb[4].mxu0 %vm65_vm0, %v1934_v11 }
 0x447   :  { %1652 = vmatpush3.bf16.msra.mxu0 %v462_v5 }
 0x448   :  { %1653 = vmatprep.subr.bf16.mxu0 %v463_v9 }
 0x44b   :  { %1654 = vmatpush3.bf16.msra.mxu0 %v463_v9 }
 0x44c   :  { %1655 = vmatprep.subr.bf16.mxu0 %v464_v14 }
 0x44f   :  { %1656 = vmatpush3.bf16.msra.mxu0 %v464_v14 }
 0x450   :  { %1657 = vmatprep.subr.bf16.mxu0 %v465_v18 }
 0x453   :  { %1658 = vmatpush3.bf16.msra.mxu0 %v465_v18 }
 0x519   :  { %v1997_v35 = vpop.f32.mrb[4].mxu0 }
 0x51a   :  { %v1999_v36 = vpop.f32.mrb[5].mxu0  ;;  %v378_v41 = vmul.f32 %v1997_v35, %v1997_v35 }
 0x51b   :  { %v376_v37 = vmul.f32 %v1999_v36, %v1999_v36  ;;  %v2003_v38 = vpop.f32.mrb[6].mxu0 }
 0x51c   :  { %v2005_v39 = vpop.f32.mrb[7].mxu0  ;;  %v379_v42 = vmul.f32 %v2003_v38, %v2003_v38 }
 0x51d   :  { %v377_v40 = vmul.f32 %v2005_v39, %v2005_v39  ;;  %384 = vrot.lane.b32.xlu0 %v376_v37, %s1835_s1 }
 0x51f   :  { %386 = vrot.lane.b32.xlu1 %v377_v40, %s1835_s1 }
 0x521   :  { %388 = vrot.lane.b32.xlu0 %v378_v41, %s1835_s1 }
 0x523   :  { %390 = vrot.lane.b32.xlu1 %v379_v42, %s1835_s1 }
 0x58f   :  { %v385_v43 = vpop.permute.xlu0 %384 }
 0x590   :  { %v396_v45 = vsel %vm200_vm2, %v1999_v36, %v385_v43 }
 0x591   :  { %v387_v44 = vpop.permute.xlu1 %386 }
 0x592   :  { %v397_v46 = vsel %vm200_vm2, %v2005_v39, %v387_v44 }
 0x593   :  { %v400_v47 = vadd.f32 %v397_v46, %v396_v45  ;;  %v389_v48 = vpop.permute.xlu0 %388 }
 0x594   :  { %v398_v49 = vsel %vm200_vm2, %v1997_v35, %v389_v48 }
 0x595   :  { %v401_v50 = vadd.f32 %v400_v47, %v398_v49  ;;  %v391_v51 = vpop.permute.xlu1 %390 }
 0x596   :  { %v399_v52 = vsel %vm200_vm2, %v2003_v38, %v391_v51 }
 0x597   :  { %v402_v53 = vadd.f32 %v401_v50, %v399_v52 }
 0x599   :  { %v403_v54 = vrot.slane %v402_v53, 4 }
 0x59b   :  { %v404_v55 = vadd.f32 %v403_v54, %v402_v53 }
 0x59d   :  { %v405_v56 = vrot.slane %v404_v55, 2 }
 0x59f   :  { %v406_v57 = vadd.f32 %v405_v56, %v404_v55 }
 0x5a1   :  { %v407_v58 = vrot.slane %v406_v57, 1 }
 0x5a3   :  { %v408_v59 = vadd.f32 %v407_v58, %v406_v57 }
 0x5a5   :  { %v409_v60 = vmul.f32 0.03125, %v408_v59 }
 0x5a7   :  { %v410_v61 = vmul.f32 %v409_v60, %v409_v60 }
 0x5a9   :  { %412 = vrot.lane.b32.xlu0 %v410_v61, %s1835_s1 }
 0x61b   :  { %v413_v62 = vpop.permute.xlu0 %412 }
 0x61c   :  { %v415_v63 = vsub.f32 %v409_v60, %v413_v62 }
 0x61e   :  { %v416_v0 = vmax.f32 %v415_v63, 0.0 }
 0x620   :  { %v417_v3 = vadd.f32 1e-05, %v416_v0 }
 0x622   :  { %1766 = vrsqrt.f32 %v417_v3 }
 0x62c   :  { %v1767_v17 = vpop.eup %1766 }
 0x62d   :  { %420 = vrot.lane.b32.xlu1 %v1767_v17, %s1835_s1  ;;  %v649_v17 = vld [vmem:[#allocation2 + $0x88] sm:$0xff] }
 0x69f   :  { %v421_v20 = vpop.permute.xlu1 %420 }
 0x6a0   :  { %v423_v23 = vmul.f32 %v1525_v19, %v421_v20  ;;  %v650_v20 = vld [vmem:[#allocation2 + $0x90] sm:$0xff] }
 0x6a2   :  { %v424_v25 = vmul.f32 %v423_v23, %v409_v60  ;;  %v432_v27 = vrot.slane %v423_v23, %v1981_v4  ;;  %v651_v23 = vld [vmem:[#allocation2 + $0x98] sm:$0xff] }
 0x6a4   :  { %v426_v28 = vrot.slane %v424_v25, 7  ;;  %v433_v30 = vmul.f32 %v432_v27, %v1999_v36  ;;  %v434_v31 = vmul.f32 %v432_v27, %v2005_v39  ;;  %v435_v32 = vmul.f32 %v1997_v35, %v432_v27 }
 0x6a5   :  { %v436_v21 = vmul.f32 %v2003_v38, %v432_v27  ;;  %v659_v25 = vpack.c.bf16 %v651_v23, %v650_v20  ;;  %v652_v27 = vld [vmem:[#allocation2 + $0xa0] sm:$0xff] }
 0x6a6   :  { %v428_v29 = vsub.f32 %v1525_v19, %v426_v28  ;;  %v658_v19 = vpack.c.bf16 %v649_v17, %v648_v16  ;;  %v653_v28 = vld [vmem:[#allocation2 + $0xa8] sm:$0xff] }
 0x6a8   :  { %v440_v22 = vrot.slane %v428_v29, %v1984_v10  ;;  %v660_v29 = vpack.c.bf16 %v653_v28, %v652_v27 }
 0x6aa   :  { %v443_v24 = vadd.f32 %v440_v22, %v435_v32  ;;  %v444_v26 = vadd.f32 %v440_v22, %v436_v21  ;;  %v441_v33 = vadd.f32 %v440_v22, %v433_v30  ;;  %v442_v34 = vadd.f32 %v440_v22, %v434_v31  ;;  %v654_v30 = vld [vmem:[#allocation2 + $0xb0] sm:$0xff]  ;;  %v655_v31 = vld [vmem:[#allocation2 + $0xb8] sm:$0xff]  ;;  %v1530_v22 = vld [vmem:[%s2269_s7 + $0x4] sm:$0x3] }
 0x6ab   :  { %v661_v21 = vpack.c.bf16 %v655_v31, %v654_v30 }
 0x6ac   :  { %v447_v37 = vmax.f32 %v443_v24, 0.0  ;;  %v448_v40 = vmax.f32 %v444_v26, 0.0  ;;  %v445_v41 = vmax.f32 %v441_v33, 0.0  ;;  %v446_v42 = vmax.f32 %v442_v34, 0.0 }
 0x6ae   :  { %v460_v43 = vpack.c.bf16 %v446_v42, %v445_v41  ;;  %v461_v44 = vpack.c.bf16 %v448_v40, %v447_v37 }
 0x6b0   :  { %1659 = vmatprep.mubr.msk.bf16.mxu0 %vm200_vm2, %v460_v43 }
 0x6b1   :  { %1660 = vmatmul.mubr.msk.bf16.vlgmr.msra.gmra.mrb[8].mxu0 %vm200_vm2, %v461_v44 }
 0x6b2   :  { %1687 = vmatprep.mubr.msk.bf16.mxu0 %vm65_vm0, %v1924_v8 }
 0x784   :  { %v1661_v35 = vpop.f32.mrb[8].mxu0 }
 0x785   :  { %v506_v36 = vpop.f32.mrb[9].mxu0 }
 0x786   :  { %v1662_v38 = vpop.f32.mrb[10].mxu0 }
 0x787   :  { %v522_v39 = vpack.c.bf16 %v1662_v38, %v1661_v35  ;;  %v509_v45 = vpop.f32.mrb[11].mxu0 }
 0x788   :  { %v521_v46 = vpack.c.bf16 %v509_v45, %v506_v36 }
 0x78a   :  { %1663 = vmatprep.subr.bf16.mxu1 %v521_v46 }
 0x78b   :  { %1664 = vmatpush3.bf16.msra.mxu1 %v521_v46 }
 0x78c   :  { %1665 = vmatprep.subr.bf16.mxu1 %v522_v39 }
 0x78f   :  { %1666 = vmatpush3.bf16.msra.mxu1 %v522_v39 }
 0x790   :  { %1671 = vmatprep.subr.bf16.mxu1 %v658_v19 }
 0x792   :  { %1668 = vmatmul.mubr.msk.bf16.vlgmr.msra.gmra.mrb[8].mxu1 %vm65_vm0, %v1934_v11 }
 0x793   :  { %1672 = vmatpush3.bf16.msra.mxu1 %v658_v19 }
 0x794   :  { %1673 = vmatprep.subr.bf16.mxu1 %v659_v25 }
 0x797   :  { %1674 = vmatpush3.bf16.msra.mxu1 %v659_v25 }
 0x798   :  { %1675 = vmatprep.subr.bf16.mxu1 %v660_v29 }
 0x79b   :  { %1676 = vmatpush3.bf16.msra.mxu1 %v660_v29 }
 0x79c   :  { %1677 = vmatprep.subr.bf16.mxu1 %v661_v21 }
 0x79f   :  { %1678 = vmatpush3.bf16.msra.mxu1 %v661_v21 }
 0x865   :  { %v2042_v47 = vpop.f32.mrb[8].mxu1 }
 0x866   :  { %v2044_v48 = vpop.f32.mrb[9].mxu1  ;;  %v574_v52 = vmul.f32 %v2042_v47, %v2042_v47 }
 0x867   :  { %v572_v8 = vmul.f32 %v2044_v48, %v2044_v48  ;;  %v2048_v49 = vpop.f32.mrb[10].mxu1 }
 0x868   :  { %v2050_v50 = vpop.f32.mrb[11].mxu1  ;;  %v575_v53 = vmul.f32 %v2048_v49, %v2048_v49 }
 0x869   :  { %v573_v51 = vmul.f32 %v2050_v50, %v2050_v50  ;;  %580 = vrot.lane.b32.xlu0 %v572_v8, %s1835_s1 }
 0x86b   :  { %582 = vrot.lane.b32.xlu1 %v573_v51, %s1835_s1 }
 0x86d   :  { %584 = vrot.lane.b32.xlu0 %v574_v52, %s1835_s1 }
 0x86f   :  { %586 = vrot.lane.b32.xlu1 %v575_v53, %s1835_s1 }
 0x8db   :  { %v581_v54 = vpop.permute.xlu0 %580 }
 0x8dc   :  { %v592_v56 = vsel %vm200_vm2, %v2044_v48, %v581_v54 }
 0x8dd   :  { %v583_v55 = vpop.permute.xlu1 %582 }
 0x8de   :  { %v593_v57 = vsel %vm200_vm2, %v2050_v50, %v583_v55 }
 0x8df   :  { %v596_v58 = vadd.f32 %v593_v57, %v592_v56  ;;  %v585_v59 = vpop.permute.xlu0 %584 }
 0x8e0   :  { %v594_v60 = vsel %vm200_vm2, %v2042_v47, %v585_v59  ;;  %v847_v59 = vld [vmem:[%s2264_s2 + $0x8] sm:$0xff] }
 0x8e1   :  { %v597_v61 = vadd.f32 %v596_v58, %v594_v60  ;;  %v587_v62 = vpop.permute.xlu1 %586  ;;  %v846_v58 = vld [vmem:[%s2264_s2] sm:$0xff] }
 0x8e2   :  { %v595_v63 = vsel %vm200_vm2, %v2048_v49, %v587_v62  ;;  %v848_v60 = vpack.c.bf16 %v847_v59, %v846_v58  ;;  %v844_v62 = vld [vmem:[%s2265_s3 + $0x8] sm:$0xff] }
 0x8e3   :  { %v598_v0 = vadd.f32 %v597_v61, %v595_v63  ;;  %v843_v61 = vld [vmem:[%s2265_s3] sm:$0xff] }
 0x8e4   :  { %v2104_v63 = vpack.c.bf16 %v844_v62, %v843_v61 }
 0x8e5   :  { %v599_v1 = vrot.slane %v598_v0, 4 }
 0x8e7   :  { %v600_v2 = vadd.f32 %v599_v1, %v598_v0 }
 0x8e9   :  { %v601_v3 = vrot.slane %v600_v2, 2 }
 0x8eb   :  { %v602_v5 = vadd.f32 %v601_v3, %v600_v2 }
 0x8ed   :  { %v603_v6 = vrot.slane %v602_v5, 1 }
 0x8ef   :  { %v604_v7 = vadd.f32 %v603_v6, %v602_v5 }
 0x8f1   :  { %v605_v9 = vmul.f32 0.03125, %v604_v7 }
 0x8f3   :  { %v606_v12 = vmul.f32 %v605_v9, %v605_v9 }
 0x8f5   :  { %608 = vrot.lane.b32.xlu0 %v606_v12, %s1835_s1 }
 0x967   :  { %v609_v13 = vpop.permute.xlu0 %608 }
 0x968   :  { %v611_v14 = vsub.f32 %v605_v9, %v609_v13 }
 0x96a   :  { %v612_v15 = vmax.f32 %v611_v14, 0.0 }
 0x96c   :  { %v613_v18 = vadd.f32 1e-05, %v612_v15 }
 0x96e   :  { %1768 = vrsqrt.f32 %v613_v18 }
 0x978   :  { %v1769_v32 = vpop.eup %1768 }
 0x979   :  { %616 = vrot.lane.b32.xlu1 %v1769_v32, %s1835_s1 }
 0x9eb   :  { %v617_v24 = vpop.permute.xlu1 %616 }
 0x9ec   :  { %v619_v26 = vmul.f32 %v1530_v22, %v617_v24 }
 0x9ee   :  { %v620_v33 = vmul.f32 %v619_v26, %v605_v9  ;;  %v628_v34 = vrot.slane %v619_v26, %v1981_v4 }
 0x9f0   :  { %v622_v37 = vrot.slane %v620_v33, 7  ;;  %v629_v41 = vmul.f32 %v628_v34, %v2044_v48  ;;  %v630_v42 = vmul.f32 %v628_v34, %v2050_v50  ;;  %v631_v43 = vmul.f32 %v2042_v47, %v628_v34 }
 0x9f1   :  { %v632_v44 = vmul.f32 %v2048_v49, %v628_v34  ;;  %v1836_v48 = vmov 0.0  }
 0x9f2   :  { %v624_v40 = vsub.f32 %v1530_v22, %v622_v37  ;;  %1697 = vmatprep.subr.bf16.mxu1 %v1836_v48 }
 0x9f4   :  { %v636_v35 = vrot.slane %v624_v40, %v1984_v10 }
 0x9f6   :  { %v639_v36 = vadd.f32 %v636_v35, %v631_v43  ;;  %v640_v38 = vadd.f32 %v636_v35, %v632_v44  ;;  %v637_v39 = vadd.f32 %v636_v35, %v629_v41  ;;  %v638_v45 = vadd.f32 %v636_v35, %v630_v42  ;;  %v1003_v41 = vld [vmem:[#allocation2 + $0xc0] sm:$0xff]  ;;  %v1004_v42 = vld [vmem:[#allocation2 + $0xc8] sm:$0xff]  ;;  %v1005_v35 = vld [vmem:[#allocation2 + $0xd0] sm:$0xff] }
 0x9f7   :  { %v1012_v44 = vpack.c.bf16 %v1004_v42, %v1003_v41  ;;  %v1158_v41 = vld [vmem:[#allocation2 + $0x100] sm:$0xff]  ;;  %v1159_v42 = vld [vmem:[#allocation2 + $0x108] sm:$0xff] }
 0x9f8   :  { %v643_v46 = vmax.f32 %v639_v36, 0.0  ;;  %v644_v8 = vmax.f32 %v640_v38, 0.0  ;;  %v641_v51 = vmax.f32 %v637_v39, 0.0  ;;  %v642_v52 = vmax.f32 %v638_v45, 0.0  ;;  %v1006_v36 = vld [vmem:[#allocation2 + $0xd8] sm:$0xff]  ;;  %v1007_v39 = vld [vmem:[#allocation2 + $0xe0] sm:$0xff] }
 0x9f9   :  { %v1013_v38 = vpack.c.bf16 %v1006_v36, %v1005_v35  ;;  %v1008_v45 = vld [vmem:[#allocation2 + $0xe8] sm:$0xff]  ;;  %v1160_v35 = vld [vmem:[#allocation2 + $0x110] sm:$0xff]  ;;  %v1161_v36 = vld [vmem:[#allocation2 + $0x118] sm:$0xff] }
 0x9fa   :  { %v656_v53 = vpack.c.bf16 %v642_v52, %v641_v51  ;;  %v657_v54 = vpack.c.bf16 %v644_v8, %v643_v46  ;;  %v1014_v46 = vpack.c.bf16 %v1008_v45, %v1007_v39  ;;  %v1009_v8 = vld [vmem:[#allocation2 + $0xf0] sm:$0xff]  ;;  %v1010_v51 = vld [vmem:[#allocation2 + $0xf8] sm:$0xff]  ;;  %v1162_v39 = vld [vmem:[#allocation2 + $0x120] sm:$0xff] }
 0x9fb   :  { %v1163_v45 = vld [vmem:[#allocation2 + $0x128] sm:$0xff] }
 0x9fc   :  { %1679 = vmatprep.mubr.msk.bf16.mxu1 %vm200_vm2, %v656_v53  ;;  %v1015_v53 = vpack.c.bf16 %v1010_v51, %v1009_v8  ;;  %v1164_v8 = vld [vmem:[#allocation2 + $0x130] sm:$0xff]  ;;  %v1165_v51 = vld [vmem:[#allocation2 + $0x138] sm:$0xff] }
 0x9fd   :  { %1680 = vmatmul.mubr.msk.bf16.vlgmr.msra.gmra.mrb[12].mxu1 %vm200_vm2, %v657_v54  ;;  %v1540_v54 = vld [vmem:[%s2269_s7 + $0x8] sm:$0x3] }
 0x9fe   :  { %1699 = vmatprep.mubr.msk.bf16.mxu1 %vm1837_vm3, %v1836_v48 }
 0xad0   :  { %v1681_v47 = vpop.f32.mrb[12].mxu1 }
 0xad1   :  { %v702_v49 = vpop.f32.mrb[13].mxu1 }
 0xad2   :  { %v1682_v50 = vpop.f32.mrb[14].mxu1 }
 0xad3   :  { %v718_v55 = vpack.c.bf16 %v1682_v50, %v1681_v47  ;;  %v705_v56 = vpop.f32.mrb[15].mxu1 }
 0xad4   :  { %v717_v57 = vpack.c.bf16 %v705_v56, %v702_v49 }
 0xad6   :  { %1683 = vmatprep.subr.bf16.mxu0 %v717_v57 }
 0xad7   :  { %1684 = vmatpush3.bf16.msra.mxu0 %v717_v57 }
 0xad8   :  { %1685 = vmatprep.subr.bf16.mxu0 %v718_v55 }
 0xadb   :  { %1686 = vmatpush3.bf16.msra.mxu0 %v718_v55 }
 0xadc   :  { %1691 = vmatprep.subr.bf16.mxu0 %v1836_v48 }
 0xade   :  { %1688 = vmatmul.mubr.msk.bf16.vlgmr.msra.gmra.mrb[12].mxu0 %vm65_vm0, %v1934_v11  ;;  %v851_v11 = vld [vmem:[%s2267_s5] sm:$0xff] }
 0xadf   :  { %1692 = vmatpush3.bf16.msra.mxu0 %v848_v60  ;;  %1693 = vmatprep.mubr.msk.bf16.mxu0 %vm1837_vm3, %v1836_v48  ;;  %v897_v0 = vpack.c.bf16 %v851_v11, %v851_v11 }
 0xae0   :  { %1703 = vmatprep.subr.bf16.mxu0 %v1836_v48 }
 0xae1   :  { %v904_v1 = vsel %vm902_vm4, %v897_v0, 0 }
 0xae2   :  { %1698 = vmatpush3.bf16.msra.mxu1 %v904_v1 }
 0xae3   :  { %1715 = vmatprep.subr.bf16.mxu1 %v1836_v48 }
 0xae6   :  { %1694 = vmatmul.mubr.msk.bf16.vlgmr.msra.gmra.mrb[16].mxu0 %vm124_vm1, %v2104_v63 }
 0xae7   :  { %1711 = vmatprep.mubr.msk.bf16.mxu0 %vm1837_vm3, %v1836_v48  ;;  %1704 = vmatpush3.bf16.msra.mxu0 %v1012_v44  ;;  %v1167_v44 = vpack.c.bf16 %v1159_v42, %v1158_v41  ;;  %v1313_v41 = vld [vmem:[#allocation2 + $0x140] sm:$0xff]  ;;  %v1314_v42 = vld [vmem:[#allocation2 + $0x148] sm:$0xff] }
 0xae8   :  { %1705 = vmatprep.subr.bf16.mxu0 %v1836_v48 }
 0xaeb   :  { %1706 = vmatpush3.bf16.msra.mxu0 %v1013_v38  ;;  %v1168_v38 = vpack.c.bf16 %v1161_v36, %v1160_v35  ;;  %v1315_v35 = vld [vmem:[#allocation2 + $0x150] sm:$0xff]  ;;  %v1316_v36 = vld [vmem:[#allocation2 + $0x158] sm:$0xff] }
 0xaec   :  { %1707 = vmatprep.subr.bf16.mxu0 %v1836_v48 }
 0xaef   :  { %1708 = vmatpush3.bf16.msra.mxu0 %v1014_v46  ;;  %v1169_v46 = vpack.c.bf16 %v1163_v45, %v1162_v39  ;;  %v1317_v39 = vld [vmem:[#allocation2 + $0x160] sm:$0xff]  ;;  %v1318_v45 = vld [vmem:[#allocation2 + $0x168] sm:$0xff] }
 0xaf0   :  { %1709 = vmatprep.subr.bf16.mxu0 %v1836_v48 }
 0xaf3   :  { %1710 = vmatpush3.bf16.msra.mxu0 %v1015_v53  ;;  %v1170_v53 = vpack.c.bf16 %v1165_v51, %v1164_v8  ;;  %v1319_v8 = vld [vmem:[#allocation2 + $0x170] sm:$0xff]  ;;  %v1320_v51 = vld [vmem:[#allocation2 + $0x178] sm:$0xff] }
 0xaf4   :  { %1733 = vmatprep.subr.bf16.mxu0 %v1836_v48 }
 0xbb1   :  { %v2114_v2 = vpop.f32.mrb[12].mxu0 }
 0xbb2   :  { %v2116_v3 = vpop.f32.mrb[13].mxu0 }
 0xbb3   :  { %v2118_v5 = vpop.f32.mrb[14].mxu0 }
 0xbb4   :  { %v2120_v6 = vpop.f32.mrb[15].mxu0 }
 0xbb9   :  { %v889_v7 = vpop.f32.mrb[16].mxu0 }
 0xbba   :  { %v1695_v9 = vpop.f32.mrb[17].mxu0 }
 0xbbb   :  { %v892_v12 = vpop.f32.mrb[18].mxu0 }
 0xbbc   :  { %v896_v13 = vpack.c.bf16 %v892_v12, %v889_v7  ;;  %v1696_v14 = vpop.f32.mrb[19].mxu0 }
 0xbbe   :  { %1700 = vmatmul.mubr.msk.bf16.vlgmr.msra.gmra.mrb[16].mxu1 %vm898_vm5, %v896_v13 }
 0xbbf   :  { %1717 = vmatprep.mubr.msk.bf16.mxu1 %vm1837_vm3, %v1836_v48 }
 0xc91   :  { %v940_v15 = vpop.f32.mrb[16].mxu1 }
 0xc92   :  { %v947_v16 = vmul.f32 %v940_v15, %v940_v15  ;;  %v1701_v17 = vpop.f32.mrb[17].mxu1 }
 0xc93   :  { %v943_v18 = vpop.f32.mrb[18].mxu1 }
 0xc94   :  { %v948_v19 = vmul.f32 %v943_v18, %v943_v18  ;;  %951 = vrot.lane.b32.xlu0 %v947_v16, %s1835_s1  ;;  %v1702_v20 = vpop.f32.mrb[19].mxu1 }
 0xc96   :  { %953 = vrot.lane.b32.xlu1 %v948_v19, %s1835_s1 }
 0xd06   :  { %v952_v23 = vpop.permute.xlu0 %951 }
 0xd07   :  { %v957_v27 = vsel %vm200_vm2, %v940_v15, %v952_v23 }
 0xd08   :  { %v954_v25 = vpop.permute.xlu1 %953 }
 0xd09   :  { %v958_v28 = vsel %vm200_vm2, %v943_v18, %v954_v25 }
 0xd0a   :  { %v959_v29 = vadd.f32 %v958_v28, %v957_v27 }
 0xd0c   :  { %v960_v30 = vrot.slane %v959_v29, 4 }
 0xd0e   :  { %v961_v31 = vadd.f32 %v960_v30, %v959_v29 }
 0xd10   :  { %v962_v32 = vrot.slane %v961_v31, 2 }
 0xd12   :  { %v963_v21 = vadd.f32 %v962_v32, %v961_v31 }
 0xd14   :  { %v964_v22 = vrot.slane %v963_v21, 1 }
 0xd16   :  { %v965_v24 = vadd.f32 %v964_v22, %v963_v21 }
 0xd18   :  { %v966_v26 = vmul.f32 0.0625, %v965_v24 }
 0xd1a   :  { %v967_v33 = vmul.f32 %v966_v26, %v966_v26 }
 0xd1c   :  { %969 = vrot.lane.b32.xlu0 %v967_v33, %s1835_s1 }
 0xd8e   :  { %v970_v34 = vpop.permute.xlu0 %969 }
 0xd8f   :  { %v972_v37 = vsub.f32 %v966_v26, %v970_v34 }
 0xd91   :  { %v973_v40 = vmax.f32 %v972_v37, 0.0 }
 0xd93   :  { %v974_v43 = vadd.f32 1e-05, %v973_v40 }
 0xd95   :  { %1770 = vrsqrt.f32 %v974_v43 }
 0xd9f   :  { %v1771_v52 = vpop.eup %1770 }
 0xda0   :  { %977 = vrot.lane.b32.xlu1 %v1771_v52, %s1835_s1 }
 0xe12   :  { %v978_v47 = vpop.permute.xlu1 %977 }
 0xe13   :  { %v980_v49 = vmul.f32 %v1540_v54, %v978_v47 }
 0xe15   :  { %v981_v50 = vmul.f32 %v980_v49, %v966_v26  ;;  %v989_v56 = vrot.slane %v980_v49, %v1981_v4 }
 0xe17   :  { %v983_v55 = vrot.slane %v981_v50, 7  ;;  %v990_v58 = vmul.f32 %v989_v56, %v940_v15  ;;  %v991_v59 = vmul.f32 %v989_v56, %v943_v18 }
 0xe19   :  { %v985_v57 = vsub.f32 %v1540_v54, %v983_v55  ;;  %v1543_v54 = vld [vmem:[%s2269_s7 + $0xa] sm:$0x3] }
 0xe1b   :  { %v995_v60 = vrot.slane %v985_v57, %v1984_v10 }
 0xe1d   :  { %v996_v61 = vadd.f32 %v995_v60, %v990_v58  ;;  %v997_v62 = vadd.f32 %v995_v60, %v991_v59 }
 0xe1f   :  { %v998_v11 = vmax.f32 %v996_v61, 0.0  ;;  %v999_v0 = vmax.f32 %v997_v62, 0.0 }
 0xe21   :  { %v1011_v1 = vpack.c.bf16 %v999_v0, %v998_v11 }
 0xe23   :  { %1712 = vmatmul.mubr.msk.bf16.vlgmr.msra.gmra.mrb[20].mxu0 %vm200_vm2, %v1011_v1 }
 0xe24   :  { %1735 = vmatprep.mubr.msk.bf16.mxu0 %vm1837_vm3, %v1836_v48 }
 0xef6   :  { %v1053_v7 = vpop.f32.mrb[20].mxu0 }
 0xef7   :  { %v1713_v9 = vpop.f32.mrb[21].mxu0 }
 0xef8   :  { %v1056_v12 = vpop.f32.mrb[22].mxu0 }
 0xef9   :  { %v1060_v13 = vpack.c.bf16 %v1056_v12, %v1053_v7  ;;  %v1714_v14 = vpop.f32.mrb[23].mxu0 }
 0xefb   :  { %1716 = vmatpush3.bf16.msra.mxu1 %v1060_v13 }
 0xefc   :  { %1721 = vmatprep.subr.bf16.mxu1 %v1836_v48 }
 0xefe   :  { %1718 = vmatmul.mubr.msk.bf16.vlgmr.msra.gmra.mrb[20].mxu1 %vm124_vm1, %v2104_v63 }
 0xeff   :  { %1729 = vmatprep.mubr.msk.bf16.mxu1 %vm1837_vm3, %v1836_v48  ;;  %1722 = vmatpush3.bf16.msra.mxu1 %v1167_v44  ;;  %v1322_v44 = vpack.c.bf16 %v1314_v42, %v1313_v41 }
 0xf00   :  { %1723 = vmatprep.subr.bf16.mxu1 %v1836_v48 }
 0xf03   :  { %1724 = vmatpush3.bf16.msra.mxu1 %v1168_v38  ;;  %v1323_v38 = vpack.c.bf16 %v1316_v36, %v1315_v35 }
 0xf04   :  { %1725 = vmatprep.subr.bf16.mxu1 %v1836_v48 }
 0xf07   :  { %1726 = vmatpush3.bf16.msra.mxu1 %v1169_v46  ;;  %v1324_v46 = vpack.c.bf16 %v1318_v45, %v1317_v39 }
 0xf08   :  { %1727 = vmatprep.subr.bf16.mxu1 %v1836_v48 }
 0xf0b   :  { %1728 = vmatpush3.bf16.msra.mxu1 %v1170_v53  ;;  %v1325_v53 = vpack.c.bf16 %v1320_v51, %v1319_v8 }
 0xf0c   :  { %1751 = vmatprep.subr.bf16.mxu1 %v1836_v48 }
 0xfd1   :  { %v1095_v15 = vpop.f32.mrb[20].mxu1 }
 0xfd2   :  { %v1102_v16 = vmul.f32 %v1095_v15, %v1095_v15  ;;  %v1719_v17 = vpop.f32.mrb[21].mxu1 }
 0xfd3   :  { %v1098_v18 = vpop.f32.mrb[22].mxu1 }
 0xfd4   :  { %v1103_v19 = vmul.f32 %v1098_v18, %v1098_v18  ;;  %1106 = vrot.lane.b32.xlu0 %v1102_v16, %s1835_s1  ;;  %v1720_v20 = vpop.f32.mrb[23].mxu1 }
 0xfd6   :  { %1108 = vrot.lane.b32.xlu1 %v1103_v19, %s1835_s1 }
0x1046   :  { %v1107_v23 = vpop.permute.xlu0 %1106 }
0x1047   :  { %v1112_v27 = vsel %vm200_vm2, %v1095_v15, %v1107_v23 }
0x1048   :  { %v1109_v25 = vpop.permute.xlu1 %1108 }
0x1049   :  { %v1113_v28 = vsel %vm200_vm2, %v1098_v18, %v1109_v25 }
0x104a   :  { %v1114_v29 = vadd.f32 %v1113_v28, %v1112_v27 }
0x104c   :  { %v1115_v30 = vrot.slane %v1114_v29, 4 }
0x104e   :  { %v1116_v31 = vadd.f32 %v1115_v30, %v1114_v29 }
0x1050   :  { %v1117_v32 = vrot.slane %v1116_v31, 2 }
0x1052   :  { %v1118_v21 = vadd.f32 %v1117_v32, %v1116_v31 }
0x1054   :  { %v1119_v22 = vrot.slane %v1118_v21, 1 }
0x1056   :  { %v1120_v24 = vadd.f32 %v1119_v22, %v1118_v21 }
0x1058   :  { %v1121_v26 = vmul.f32 0.0625, %v1120_v24 }
0x105a   :  { %v1122_v33 = vmul.f32 %v1121_v26, %v1121_v26 }
0x105c   :  { %1124 = vrot.lane.b32.xlu0 %v1122_v33, %s1835_s1 }
0x10ce   :  { %v1125_v34 = vpop.permute.xlu0 %1124 }
0x10cf   :  { %v1127_v37 = vsub.f32 %v1121_v26, %v1125_v34 }
0x10d1   :  { %v1128_v40 = vmax.f32 %v1127_v37, 0.0 }
0x10d3   :  { %v1129_v43 = vadd.f32 1e-05, %v1128_v40 }
0x10d5   :  { %1772 = vrsqrt.f32 %v1129_v43 }
0x10df   :  { %v1773_v52 = vpop.eup %1772 }
0x10e0   :  { %1132 = vrot.lane.b32.xlu1 %v1773_v52, %s1835_s1 }
0x1152   :  { %v1133_v47 = vpop.permute.xlu1 %1132 }
0x1153   :  { %v1135_v49 = vmul.f32 %v1543_v54, %v1133_v47 }
0x1155   :  { %v1136_v50 = vmul.f32 %v1135_v49, %v1121_v26  ;;  %v1144_v56 = vrot.slane %v1135_v49, %v1981_v4 }
0x1157   :  { %v1138_v55 = vrot.slane %v1136_v50, 7  ;;  %v1145_v58 = vmul.f32 %v1144_v56, %v1095_v15  ;;  %v1146_v59 = vmul.f32 %v1144_v56, %v1098_v18 }
0x1159   :  { %v1140_v57 = vsub.f32 %v1543_v54, %v1138_v55  ;;  %v1546_v54 = vld [vmem:[%s2269_s7 + $0xc] sm:$0x3] }
0x115b   :  { %v1150_v60 = vrot.slane %v1140_v57, %v1984_v10 }
0x115d   :  { %v1151_v61 = vadd.f32 %v1150_v60, %v1145_v58  ;;  %v1152_v62 = vadd.f32 %v1150_v60, %v1146_v59 }
0x115f   :  { %v1153_v11 = vmax.f32 %v1151_v61, 0.0  ;;  %v1154_v0 = vmax.f32 %v1152_v62, 0.0 }
0x1161   :  { %v1166_v1 = vpack.c.bf16 %v1154_v0, %v1153_v11 }
0x1163   :  { %1730 = vmatmul.mubr.msk.bf16.vlgmr.msra.gmra.mrb[24].mxu1 %vm200_vm2, %v1166_v1 }
0x1164   :  { %1753 = vmatprep.mubr.msk.bf16.mxu1 %vm1837_vm3, %v1836_v48 }
0x1236   :  { %v1208_v7 = vpop.f32.mrb[24].mxu1 }
0x1237   :  { %v1731_v9 = vpop.f32.mrb[25].mxu1 }
0x1238   :  { %v1211_v12 = vpop.f32.mrb[26].mxu1 }
0x1239   :  { %v1215_v13 = vpack.c.bf16 %v1211_v12, %v1208_v7  ;;  %v1732_v14 = vpop.f32.mrb[27].mxu1 }
0x123b   :  { %1734 = vmatpush3.bf16.msra.mxu0 %v1215_v13 }
0x123c   :  { %1739 = vmatprep.subr.bf16.mxu0 %v1836_v48 }
0x123e   :  { %1736 = vmatmul.mubr.msk.bf16.vlgmr.msra.gmra.mrb[24].mxu0 %vm124_vm1, %v2104_v63 }
0x123f   :  { %1747 = vmatprep.mubr.msk.bf16.mxu0 %vm1837_vm3, %v1836_v48  ;;  %1740 = vmatpush3.bf16.msra.mxu0 %v1322_v44 }
0x1240   :  { %1741 = vmatprep.subr.bf16.mxu0 %v1836_v48 }
0x1243   :  { %1742 = vmatpush3.bf16.msra.mxu0 %v1323_v38 }
0x1244   :  { %1743 = vmatprep.subr.bf16.mxu0 %v1836_v48 }
0x1247   :  { %1744 = vmatpush3.bf16.msra.mxu0 %v1324_v46 }
0x1248   :  { %1745 = vmatprep.subr.bf16.mxu0 %v1836_v48 }
0x124b   :  { %1746 = vmatpush3.bf16.msra.mxu0 %v1325_v53 }
0x1311   :  { %v1250_v15 = vpop.f32.mrb[24].mxu0 }
0x1312   :  { %v1257_v16 = vmul.f32 %v1250_v15, %v1250_v15  ;;  %v1737_v17 = vpop.f32.mrb[25].mxu0 }
0x1313   :  { %v1253_v18 = vpop.f32.mrb[26].mxu0 }
0x1314   :  { %v1258_v19 = vmul.f32 %v1253_v18, %v1253_v18  ;;  %1261 = vrot.lane.b32.xlu0 %v1257_v16, %s1835_s1  ;;  %v1738_v20 = vpop.f32.mrb[27].mxu0 }
0x1315   :  { %v768_v20 = vmul.f32 %v2116_v3, %v2116_v3 }
0x1316   :  { %1263 = vrot.lane.b32.xlu1 %v1258_v19, %s1835_s1 }
0x1386   :  { %v1262_v23 = vpop.permute.xlu0 %1261 }
0x1387   :  { %v1267_v27 = vsel %vm200_vm2, %v1250_v15, %v1262_v23  ;;  %v770_v23 = vmul.f32 %v2114_v2, %v2114_v2 }
0x1388   :  { %v1264_v25 = vpop.permute.xlu1 %1263 }
0x1389   :  { %v1268_v28 = vsel %vm200_vm2, %v1253_v18, %v1264_v25  ;;  %v771_v25 = vmul.f32 %v2118_v5, %v2118_v5 }
0x138a   :  { %v1269_v29 = vadd.f32 %v1268_v28, %v1267_v27 }
0x138c   :  { %v1270_v30 = vrot.slane %v1269_v29, 4 }
0x138e   :  { %v1271_v31 = vadd.f32 %v1270_v30, %v1269_v29 }
0x1390   :  { %v1272_v32 = vrot.slane %v1271_v31, 2 }
0x1392   :  { %v1273_v21 = vadd.f32 %v1272_v32, %v1271_v31 }
0x1394   :  { %v1274_v22 = vrot.slane %v1273_v21, 1 }
0x1396   :  { %v1275_v24 = vadd.f32 %v1274_v22, %v1273_v21 }
0x1398   :  { %v1276_v26 = vmul.f32 0.0625, %v1275_v24 }
0x139a   :  { %v1277_v33 = vmul.f32 %v1276_v26, %v1276_v26 }
0x139c   :  { %1279 = vrot.lane.b32.xlu0 %v1277_v33, %s1835_s1 }
0x140e   :  { %v1280_v34 = vpop.permute.xlu0 %1279 }
0x140f   :  { %v1282_v37 = vsub.f32 %v1276_v26, %v1280_v34 }
0x1411   :  { %v1283_v40 = vmax.f32 %v1282_v37, 0.0 }
0x1413   :  { %v1284_v43 = vadd.f32 1e-05, %v1283_v40 }
0x1415   :  { %1774 = vrsqrt.f32 %v1284_v43 }
0x141f   :  { %v1775_v52 = vpop.eup %1774 }
0x1420   :  { %1287 = vrot.lane.b32.xlu1 %v1775_v52, %s1835_s1 }
0x1492   :  { %v1288_v47 = vpop.permute.xlu1 %1287 }
0x1493   :  { %v1290_v49 = vmul.f32 %v1546_v54, %v1288_v47 }
0x1495   :  { %v1291_v50 = vmul.f32 %v1290_v49, %v1276_v26  ;;  %v1299_v56 = vrot.slane %v1290_v49, %v1981_v4 }
0x1497   :  { %v1293_v55 = vrot.slane %v1291_v50, 7  ;;  %v1300_v58 = vmul.f32 %v1299_v56, %v1250_v15  ;;  %v1301_v48 = vmul.f32 %v1299_v56, %v1253_v18 }
0x1499   :  { %v1295_v57 = vsub.f32 %v1546_v54, %v1293_v55 }
0x149b   :  { %v1305_v59 = vrot.slane %v1295_v57, %v1984_v10 }
0x149d   :  { %v1306_v60 = vadd.f32 %v1305_v59, %v1300_v58  ;;  %v1307_v61 = vadd.f32 %v1305_v59, %v1301_v48 }
0x149f   :  { %v1308_v62 = vmax.f32 %v1306_v60, 0.0  ;;  %v1309_v11 = vmax.f32 %v1307_v61, 0.0 }
0x14a1   :  { %v1321_v0 = vpack.c.bf16 %v1309_v11, %v1308_v62  ;;  %v1549_v62 = vld [vmem:[%s2269_s7 + $0xe] sm:$0x3] }
0x14a3   :  { %1748 = vmatmul.mubr.msk.bf16.vlgmr.msra.gmra.mrb[28].mxu0 %vm200_vm2, %v1321_v0 }
0x1576   :  { %v1363_v1 = vpop.f32.mrb[28].mxu0 }
0x1577   :  { %v1749_v7 = vpop.f32.mrb[29].mxu0 }
0x1578   :  { %v1366_v9 = vpop.f32.mrb[30].mxu0 }
0x1579   :  { %v1370_v12 = vpack.c.bf16 %v1366_v9, %v1363_v1  ;;  %v1750_v13 = vpop.f32.mrb[31].mxu0 }
0x157b   :  { %1752 = vmatpush3.bf16.msra.mxu1 %v1370_v12  ;;  %v1535_v12 = vld [vmem:[%s2269_s7 + $0x6] sm:$0x3] }
0x157e   :  { %1754 = vmatmul.mubr.msk.bf16.vlgmr.msra.gmra.mrb[28].mxu1 %vm124_vm1, %v2104_v63  ;;  %v769_v63 = vmul.f32 %v2120_v6, %v2120_v6 }
0x1651   :  { %v2187_v14 = vpop.f32.mrb[28].mxu1 }
0x1652   :  { %v1412_v15 = vmul.f32 %v2187_v14, %v2187_v14  ;;  %v1755_v16 = vpop.f32.mrb[29].mxu1 }
0x1653   :  { %v2191_v17 = vpop.f32.mrb[30].mxu1 }
0x1654   :  { %v1413_v18 = vmul.f32 %v2191_v17, %v2191_v17  ;;  %1416 = vrot.lane.b32.xlu0 %v1412_v15, %s1835_s1  ;;  %v1756_v19 = vpop.f32.mrb[31].mxu1 }
0x1656   :  { %1418 = vrot.lane.b32.xlu1 %v1413_v18, %s1835_s1 }
0x1658   :  { %776 = vrot.lane.b32.xlu0 %v768_v20, %s1835_s1 }
0x165a   :  { %778 = vrot.lane.b32.xlu1 %v769_v63, %s1835_s1 }
0x165c   :  { %780 = vrot.lane.b32.xlu0 %v770_v23, %s1835_s1 }
0x165e   :  { %782 = vrot.lane.b32.xlu1 %v771_v25, %s1835_s1 }
0x16c6   :  { %v1417_v27 = vpop.permute.xlu0 %1416 }
0x16c7   :  { %v1422_v29 = vsel %vm200_vm2, %v2187_v14, %v1417_v27 }
0x16c8   :  { %v1419_v28 = vpop.permute.xlu1 %1418 }
0x16c9   :  { %v1423_v30 = vsel %vm200_vm2, %v2191_v17, %v1419_v28 }
0x16ca   :  { %v1424_v31 = vadd.f32 %v1423_v30, %v1422_v29  ;;  %v777_v32 = vpop.permute.xlu0 %776 }
0x16cb   :  { %v788_v24 = vsel %vm200_vm2, %v2116_v3, %v777_v32 }
0x16cc   :  { %v1425_v21 = vrot.slane %v1424_v31, 4  ;;  %v779_v22 = vpop.permute.xlu1 %778 }
0x16cd   :  { %v789_v26 = vsel %vm200_vm2, %v2120_v6, %v779_v22 }
0x16ce   :  { %v1426_v33 = vadd.f32 %v1425_v21, %v1424_v31  ;;  %v792_v34 = vadd.f32 %v789_v26, %v788_v24  ;;  %v781_v37 = vpop.permute.xlu0 %780 }
0x16cf   :  { %v790_v40 = vsel %vm200_vm2, %v2114_v2, %v781_v37 }
0x16d0   :  { %v1427_v41 = vrot.slane %v1426_v33, 2  ;;  %v793_v42 = vadd.f32 %v792_v34, %v790_v40  ;;  %v783_v43 = vpop.permute.xlu1 %782 }
0x16d1   :  { %v791_v44 = vsel %vm200_vm2, %v2118_v5, %v783_v43 }
0x16d2   :  { %v1428_v35 = vadd.f32 %v1427_v41, %v1426_v33  ;;  %v794_v36 = vadd.f32 %v793_v42, %v791_v44  ;;  %v1552_v42 = vld [vmem:[%s2270_s8] ss:$0 sm:$0xff] }
0x16d4   :  { %v1429_v38 = vrot.slane %v1428_v35, 1  ;;  %v795_v39 = vrot.slane %v794_v36, 4 }
0x16d6   :  { %v1430_v3 = vadd.f32 %v1429_v38, %v1428_v35  ;;  %v796_v45 = vadd.f32 %v795_v39, %v794_v36 }
0x16d8   :  { %v797_v46 = vrot.slane %v796_v45, 2  ;;  %v1431_v8 = vmul.f32 0.0625, %v1430_v3 }
0x16da   :  { %v798_v51 = vadd.f32 %v797_v46, %v796_v45  ;;  %v1432_v52 = vmul.f32 %v1431_v8, %v1431_v8 }
0x16dc   :  { %v799_v53 = vrot.slane %v798_v51, 1  ;;  %1434 = vrot.lane.b32.xlu0 %v1432_v52, %s1835_s1 }
0x16de   :  { %v800_v2 = vadd.f32 %v799_v53, %v798_v51 }
0x16e0   :  { %v801_v54 = vmul.f32 0.03125, %v800_v2 }
0x16e2   :  { %v802_v47 = vmul.f32 %v801_v54, %v801_v54 }
0x16e4   :  { %804 = vrot.lane.b32.xlu1 %v802_v47, %s1835_s1 }
0x174e   :  { %v1435_v49 = vpop.permute.xlu0 %1434 }
0x174f   :  { %v1437_v50 = vsub.f32 %v1431_v8, %v1435_v49 }
0x1751   :  { %v1438_v55 = vmax.f32 %v1437_v50, 0.0 }
0x1753   :  { %v1439_v56 = vadd.f32 1e-05, %v1438_v55 }
0x1755   :  { %1776 = vrsqrt.f32 %v1439_v56 }
0x1756   :  { %v805_v57 = vpop.permute.xlu1 %804 }
0x1757   :  { %v807_v58 = vsub.f32 %v801_v54, %v805_v57 }
0x1759   :  { %v808_v48 = vmax.f32 %v807_v58, 0.0 }
0x175b   :  { %v809_v59 = vadd.f32 1e-05, %v808_v48 }
0x175d   :  { %1778 = vrsqrt.f32 %v809_v59 }
0x175f   :  { %v1777_v60 = vpop.eup %1776 }
0x1760   :  { %1442 = vrot.lane.b32.xlu0 %v1777_v60, %s1835_s1 }
0x1767   :  { %v1779_v61 = vpop.eup %1778 }
0x1768   :  { %812 = vrot.lane.b32.xlu1 %v1779_v61, %s1835_s1 }
0x17d2   :  { %v1443_v11 = vpop.permute.xlu0 %1442 }
0x17d3   :  { %v1445_v0 = vmul.f32 %v1549_v62, %v1443_v11 }
0x17d5   :  { %v1446_v1 = vmul.f32 %v1445_v0, %v1431_v8  ;;  %v1454_v9 = vrot.slane %v1445_v0, %v1981_v4 }
0x17d7   :  { %v1448_v7 = vrot.slane %v1446_v1, 7  ;;  %v1455_v16 = vmul.f32 %v1454_v9, %v2187_v14  ;;  %v1456_v18 = vmul.f32 %v1454_v9, %v2191_v17 }
0x17d9   :  { %v1450_v13 = vsub.f32 %v1549_v62, %v1448_v7 }
0x17da   :  { %v813_v15 = vpop.permute.xlu1 %812 }
0x17db   :  { %v1460_v19 = vrot.slane %v1450_v13, %v1984_v10  ;;  %v815_v20 = vmul.f32 %v1535_v12, %v813_v15 }
0x17dd   :  { %v1461_v63 = vadd.f32 %v1460_v19, %v1455_v16  ;;  %v1462_v23 = vadd.f32 %v1460_v19, %v1456_v18  ;;  %v816_v25 = vmul.f32 %v815_v20, %v801_v54  ;;  %v824_v28 = vrot.slane %v815_v20, %v1981_v4 }
0x17df   :  { %v818_v27 = vrot.slane %v816_v25, 7  ;;  %v1463_v29 = vmax.f32 %v1461_v63, 0.0  ;;  %v1464_v30 = vmax.f32 %v1462_v23, 0.0  ;;  %v825_v22 = vmul.f32 %v824_v28, %v2120_v6 }
0x17e0   :  { %v826_v14 = vmul.f32 %v2118_v5, %v824_v28 }
0x17e1   :  { %v820_v31 = vsub.f32 %v1535_v12, %v818_v27  ;;  %v1466_v32 = vrot.slane %v1463_v29, 7  ;;  %v1469_v21 = vrot.slane %v1464_v30, 6 }
0x17e3   :  { %v830_v17 = vrot.slane %v820_v31, %v1984_v10  ;;  %v1471_v24 = vsel %vm841_vm6, %v1466_v32, %v1469_v21 }
0x17e4   :  { %1473 = vrot.lane.b32.xlu0 %v1471_v24, %s1835_s1  ;;  %s1806_s1 = scalar_lea.vmem %s1509_s26, 32 }
0x17e5   :  { %v831_v26 = vadd.f32 %v830_v17, %v825_v22  ;;  %v832_v33 = vadd.f32 %v830_v17, %v826_v14  ;;  %p1807_p8 = scmp.ne.s32.totalorder %s1509_s26, %s1806_s1  ;;  %p1812_p10 = scmp.lt.s32.totalorder %s1806_s1, %s1806_s1 }
0x17e7   :  { %v833_v34 = vmax.f32 %v831_v26, 0.0  ;;  %v834_v37 = vmax.f32 %v832_v33, 0.0  ;;  %p1813_p11 = por %p1812_p10, %p1811_p9 }
0x17e9   :  { %v836_v4 = vrot.slane %v833_v34, 7  ;;  %v839_v40 = vrot.slane %v834_v37, 6  ;;  %p1814_p12 = pnand %p1813_p11, %p1807_p8 }
0x17eb   :  { %v842_v41 = vsel %vm841_vm6, %v836_v4, %v839_v40 }
0x1856   :  { %v1474_v43 = vpop.permute.xlu0 %1473 }
0x1857   :  { %v1476_v6 = vsel %vm200_vm2, %v842_v41, %v1474_v43 }
0x1858   :  { %1477 = vst [vmem:[#allocation5] sm:$0x3] %v1476_v6  ;;  %v1484_v10 = vmul.f32 %v1552_v42, %v1476_v6 }
0x185a   :  { %v1486_v5 = vsel %vm1485_vm7, %v1484_v10, 0.0 }
0x185b   :  { %1487 = vadd.xlane.f32.xlu1 %v1486_v5 }
0x185c   :  { %1817 = shalt.err (!%p1814_p12)
}
0x185d   :  { %s1818_s29 = scalar_lea.hbm %s2271_s9, 32 }
0x185e   :  { %p1819_p13 = scmp.ne.s32.totalorder %s2271_s9, %s1818_s29  ;;  %p1822_p0 = scmp.lt.u32.totalorder %s1818_s29, %s2271_s9 }
0x1860   :  { %p1824_p1 = pnand %p1822_p0, %p1819_p13 }
0x1862   :  { %1827 = shalt.err (!%p1824_p1)
}
0x1863   :  { %1511 = dma.vmem_to_hbm [thread:$0]  %s1509_s26, 32, %s2271_s9, [#allocation4]   ;;  %v1553_v44 = vld [vmem:[%s2270_s8 + $0x1] ss:$0 sm:$0xff]  ;;  %vm1500_vm8 = vcmask 1024  }
0x18e8   :  { %v1488_v35 = vpop.xlane.xlu1 %1487 }
0x18e9   :  { %v1493_v36 = vadd.f32 %v1553_v44, %v1488_v35 }
0x18eb   :  { %v1554_v38 = vmul.f32 -1.442695, %v1493_v36 }
0x18ed   :  { %1780 = vpow2.f32 %v1554_v38 }
0x18f7   :  { %v1781_v39 = vpop.eup %1780 }
0x18f8   :  { %v1497_v3 = vadd.f32 1.0, %v1781_v39 }
0x18fa   :  { %1782 = vrcp.f32 %v1497_v3 }
0x1904   :  { %v1783_v45 = vpop.eup %1782 }
0x1905   :  { %1501 = vst.msk [vmem:[%s2272_s10] sm:$0x3] %vm1500_vm8, %v1783_v45 }
0x1906   :  { %1830 = dma.done.wait [#allocation4], 32  }
0x1907   :  { %1831 = vsyncadd [#allocation4], 4294967264 }
0x1908   :  { %1519 = vsyncpa [#allocation3], 1 }
0x1909   :  { %1520 = vsyncpa [#allocation4], 1 }

</bundles_post_ra>
